<compile_context>
chip_gen: v7x
topology: tpu7x:2x2x1
jax: 0.10.0
libtpu: 0.0.40
codegen_flags: <defaults>
</compile_context>

<pallas_src>
import functools

import jax
import jax.numpy as jnp
from jax import lax
from jax.experimental import pallas as pl
from jax.experimental.pallas import tpu as pltpu

N = 128          # hard-coded by the PyTorch module
D = 32           # feature dimension (free choice)
K_AUG = 40       # D + 2 (||.||^2 and 1 columns), zero-padded to a multiple of 8
EPS = 1e-12
BIG = 1e30
OUT_LANES = 128  # lane-aligned output row


def _perm_chunk4(col):
    # chunk(4, 0) reorder used by the module: [a, b, c, d] -> [a, c, b, d] on 32-row
    # chunks (sublane-aligned slices of a [128, 1] column -> cheap).
    return jnp.concatenate([col[0:32], col[64:96], col[32:64], col[96:128]], axis=0)


def _triplet_kernel(f1_ref, f2_ref, trow_ref, tcol_ref, out_ref, *, margin):
    x = f1_ref[...]        # [N, D]  global_feat1
    y = f2_ref[...]        # [N, D]  global_feat2
    t_row = trow_ref[...]  # [1, N]  target[j]
    t_col = tcol_ref[...]  # [N, 1]  target[i]

    # ---- squared euclidean distances, single augmented MXU matmul ----
    # d2[i,j] = ||x_i||^2 + ||y_j||^2 - 2 x_i.y_j = dot(x_aug[i], y_aug[j])
    xx = jnp.sum(x * x, axis=1, keepdims=True)                              # [N, 1]
    yy = jnp.sum(y * y, axis=1, keepdims=True)                              # [N, 1]
    ones_col = jnp.ones((N, 1), jnp.float32)
    zpad = jnp.zeros((N, K_AUG - D - 2), jnp.float32)
    x_aug = jnp.concatenate([x * (-2.0), xx, ones_col, zpad], axis=1)       # [N, 40]
    y_aug = jnp.concatenate([y, ones_col, yy, zpad], axis=1)                # [N, 40]
    d2 = lax.dot_general(x_aug, y_aug, (((1,), (1,)), ((), ())),
                         preferred_element_type=jnp.float32)                # [N, N]

    is_pos = (t_row == t_col)                                               # [N, N]
    # Hardest positive per anchor, mined on squared distances (sqrt deferred).
    d2_ap = jnp.max(jnp.where(is_pos, d2, -BIG), axis=1, keepdims=True)     # [N, 1]
    # Negatives-only squared distances; positives pushed to BIG.  Every anchor has 112
    # negatives (hard-coded by the module), so the mins below can only hit negatives.
    dneg = jnp.where(is_pos, BIG, d2)                                       # [N, N]
    # d2 / is_pos are dead from here on.

    # ---- two nearest negatives per anchor (topk(k=2, largest=False)), tie-break = min idx ----
    # All index bookkeeping in int32 (no full-matrix int->f32 convert pass).
    j_idx = lax.broadcasted_iota(jnp.int32, (N, N), 1)                      # [N, N] i32
    m1 = jnp.min(dneg, axis=1, keepdims=True)
    idx1 = jnp.min(jnp.where(dneg == m1, j_idx, N), axis=1, keepdims=True)  # [N, 1] i32
    dneg2 = jnp.where(j_idx == idx1, BIG, dneg)
    m2 = jnp.min(dneg2, axis=1, keepdims=True)
    idx2 = jnp.min(jnp.where(dneg2 == m2, j_idx, N), axis=1, keepdims=True) # [N, 1] i32

    # sqrt issued after mining so d2_ap's column isn't live across the high-pressure region.
    dist_ap = jnp.sqrt(jnp.maximum(d2_ap, EPS))                             # [N, 1]

    # ---- chunk(4,0) reorder on the index columns, then gather-as-one-hot-matmul ----
    # mid_all[i] = 0.5 * (x[idx1[p(i)]] + x[idx2[p(i)]]) comes straight off the MXU in
    # the final cat(feat_rgb_mid, feat_ir_mid) order; feat_mean never materializes.
    # TODO(synk): the reference's `mean(dim=0).view(1,-1)` would produce [1, 2d] and
    # break the subsequent euclidean_dist; we implement the evident intent ([d] mean).
    idx1p = _perm_chunk4(idx1)
    idx2p = _perm_chunk4(idx2)
    # Fresh iota here: rematerializable, avoids carrying j_idx's 16 vregs from mining.
    sel_iota = lax.broadcasted_iota(jnp.int32, (N, N), 1)
    sel = jnp.where((sel_iota == idx1p) | (sel_iota == idx2p), 0.5, 0.0)    # [N, N] f32
    mid_all = jnp.dot(sel, x, preferred_element_type=jnp.float32)           # [N, D]

    # ---- dist_an = cat(diag(euclid(feat_rgb, rgb_mid)), diag(euclid(feat_ir, ir_mid))) ----
    # Only rows of global_feat1 feed the diagonals; fused (x - mid)^2 form.
    diff = x - mid_all
    d2_an = jnp.sum(diff * diff, axis=1, keepdims=True)                     # [N, 1]
    dist_an = jnp.sqrt(jnp.maximum(d2_an, EPS))                             # [N, 1]

    triplets = dist_ap - dist_an + margin                                   # [N, 1]
    # Module hard-codes the /64 (= N/2) normalization, independent of the active count.
    hinge = jnp.maximum(triplets, 0.0) * (1.0 / 64.0)                       # [N, 1]
    ind = (triplets > 0.0).astype(jnp.float32)                              # [N, 1]
    packed = jnp.concatenate([hinge, ind], axis=1)                          # [N, 2]
    sums = jnp.sum(packed, axis=0, keepdims=True)                           # [1, 2] one tree
    # Lane-aligned output row: loss in lane 0, count in lane 1, zeros elsewhere.
    out_ref[...] = jnp.concatenate(
        [sums, jnp.zeros((1, OUT_LANES - 2), jnp.float32)], axis=1)         # [1, 128]


@functools.partial(jax.jit, static_argnames=("margin",))
def triplet_loss_balanced(global_feat1, global_feat2, target, margin=0.3):
    t = target.astype(jnp.int32)
    t_row = t.reshape(1, N)
    t_col = t.reshape(N, 1)
    kernel = functools.partial(_triplet_kernel, margin=float(margin))
    out = pl.pallas_call(
        kernel,
        out_shape=jax.ShapeDtypeStruct((1, OUT_LANES), jnp.float32),
        grid_spec=pltpu.PrefetchScalarGridSpec(
            num_scalar_prefetch=0,
            grid=(1,),
            in_specs=[
                pl.BlockSpec((N, D), lambda i: (0, 0)),
                pl.BlockSpec((N, D), lambda i: (0, 0)),
                pl.BlockSpec((1, N), lambda i: (0, 0)),
                pl.BlockSpec((N, 1), lambda i: (0, 0)),
            ],
            out_specs=pl.BlockSpec((1, OUT_LANES), lambda i: (0, 0)),
        ),
        compiler_params=pltpu.CompilerParams(dimension_semantics=("arbitrary",)),
    )(global_feat1.astype(jnp.float32), global_feat2.astype(jnp.float32), t_row, t_col)
    return out[0, 0], out[0, 1].astype(jnp.int32)


def _reference(feat1, feat2, target, margin):
    """Pure-JAX mirror of the (intended) PyTorch forward, for a sanity check."""
    def edist(a, b):
        aa = jnp.sum(a * a, axis=1, keepdims=True)
        bb = jnp.sum(b * b, axis=1, keepdims=True).T
        d2 = aa + bb - 2.0 * jnp.dot(a, b.T, precision=lax.Precision.HIGHEST)
        return jnp.sqrt(jnp.clip(d2, EPS))

    dist = edist(feat1, feat2)
    is_pos = target[None, :] == target[:, None]
    is_neg = ~is_pos
    dist_ap = jnp.max(jnp.where(is_pos, dist, -jnp.inf), axis=1)
    dneg = jnp.where(is_neg, dist, jnp.inf)
    i1 = jnp.argmin(dneg, axis=1)
    dneg2 = dneg.at[jnp.arange(N), i1].set(jnp.inf)
    i2 = jnp.argmin(dneg2, axis=1)
    feat_mean = 0.5 * (feat1[i1] + feat1[i2])
    mid_all = jnp.concatenate([feat_mean[0:32], feat_mean[64:96],
                               feat_mean[32:64], feat_mean[96:128]], axis=0)
    d2 = (jnp.sum(feat1 * feat1, 1) + jnp.sum(mid_all * mid_all, 1)
          - 2.0 * jnp.sum(feat1 * mid_all, 1))
    dist_an = jnp.sqrt(jnp.clip(d2, EPS))
    trip = dist_ap - dist_an + margin
    pos = trip > 0
    return jnp.sum(jnp.where(pos, trip, 0.0)) / 64.0, jnp.sum(pos.astype(jnp.int32))


if __name__ == "__main__":
    key = jax.random.PRNGKey(0)
    k1, k2 = jax.random.split(key)
    global_feat1 = jax.random.normal(k1, (N, D), jnp.float32)
    global_feat2 = jax.random.normal(k2, (N, D), jnp.float32)
    # 8 identities x 8 samples in the RGB half, same ids in the IR half
    # -> every anchor has 16 positives / 112 negatives, matching the hard-coded
    #    view(128, -1) / view(112, -1) in the module.
    ids = jnp.repeat(jnp.arange(8, dtype=jnp.int32), 8)
    target = jnp.concatenate([ids, ids], axis=0)          # [128]
    margin = 0.3

    loss, count = triplet_loss_balanced(global_feat1, global_feat2, target, margin=margin)
    jax.block_until_ready((loss, count))

    ref_loss, ref_count = _reference(global_feat1, global_feat2, target, margin)
    assert int(count) == int(ref_count), (int(count), int(ref_count))
    assert abs(float(loss) - float(ref_loss)) <= 2e-3 * max(1.0, abs(float(ref_loss))), \
        (float(loss), float(ref_loss))
    print("KERNEL_OK")
</pallas_src>

<mosaic_0001>
module attributes {stable_mosaic.version = 11 : i64} {
  func.func @_triplet_kernel(%arg0: i32, %arg1: memref<128x32xf32, #tpu.memory_space<vmem>>, %arg2: memref<128x32xf32, #tpu.memory_space<vmem>>, %arg3: memref<1x128xi32, #tpu.memory_space<vmem>>, %arg4: memref<128x1xi32, #tpu.memory_space<vmem>>, %arg5: memref<1x128xf32, #tpu.memory_space<vmem>>) attributes {dimension_semantics = [#tpu.dimension_semantics<arbitrary>], iteration_bounds = array<i64: 1>, scalar_prefetch = 0 : i64, scratch_operands = 0 : i64, tpu.core_type = #tpu.core_type<tc>, window_params = [{pipeline_mode = #tpu.pipeline_mode<synchronous>, transform_indices = @transform_0, window_bounds = array<i64: 128, 32>}, {pipeline_mode = #tpu.pipeline_mode<synchronous>, transform_indices = @transform_1, window_bounds = array<i64: 128, 32>}, {pipeline_mode = #tpu.pipeline_mode<synchronous>, transform_indices = @transform_2, window_bounds = array<i64: 1, 128>}, {pipeline_mode = #tpu.pipeline_mode<synchronous>, transform_indices = @transform_3, window_bounds = array<i64: 128, 1>}, {pipeline_mode = #tpu.pipeline_mode<synchronous>, transform_indices = @transform_4, window_bounds = array<i64: 1, 128>}]} {
    %c0 = arith.constant 0 : index
    %c0_0 = arith.constant 0 : index
    %0 = vector.load %arg1[%c0, %c0_0] : memref<128x32xf32, #tpu.memory_space<vmem>>, vector<128x32xf32>
    %c0_1 = arith.constant 0 : index
    %c0_2 = arith.constant 0 : index
    %1 = vector.load %arg2[%c0_1, %c0_2] : memref<128x32xf32, #tpu.memory_space<vmem>>, vector<128x32xf32>
    %c0_3 = arith.constant 0 : index
    %c0_4 = arith.constant 0 : index
    %2 = vector.load %arg3[%c0_3, %c0_4] : memref<1x128xi32, #tpu.memory_space<vmem>>, vector<1x128xi32>
    %c0_5 = arith.constant 0 : index
    %c0_6 = arith.constant 0 : index
    %3 = vector.load %arg4[%c0_5, %c0_6] : memref<128x1xi32, #tpu.memory_space<vmem>>, vector<128x1xi32>
    %4 = arith.mulf %0, %0 : vector<128x32xf32>
    %cst = arith.constant dense<0.000000e+00> : vector<128xf32>
    %5 = vector.multi_reduction <add>, %4, %cst [1] : vector<128x32xf32> to vector<128xf32>
    %6 = vector.shape_cast %5 : vector<128xf32> to vector<128x1xf32>
    %7 = arith.mulf %1, %1 : vector<128x32xf32>
    %cst_7 = arith.constant dense<0.000000e+00> : vector<128xf32>
    %8 = vector.multi_reduction <add>, %7, %cst_7 [1] : vector<128x32xf32> to vector<128xf32>
    %9 = vector.shape_cast %8 : vector<128xf32> to vector<128x1xf32>
    %cst_8 = arith.constant 1.000000e+00 : f32
    %10 = vector.broadcast %cst_8 : f32 to vector<128x1xf32>
    %cst_9 = arith.constant 0.000000e+00 : f32
    %11 = vector.broadcast %cst_9 : f32 to vector<128x6xf32>
    %cst_10 = arith.constant -2.000000e+00 : f32
    %12 = vector.broadcast %cst_10 : f32 to vector<128x32xf32>
    %13 = arith.mulf %0, %12 : vector<128x32xf32>
    %14 = tpu.concatenate %13, %6, %10, %11 in 1 : vector<128x32xf32>, vector<128x1xf32>, vector<128x1xf32>, vector<128x6xf32> -> vector<128x40xf32>
    %15 = tpu.concatenate %1, %10, %9, %11 in 1 : vector<128x32xf32>, vector<128x1xf32>, vector<128x1xf32>, vector<128x6xf32> -> vector<128x40xf32>
    %cst_11 = arith.constant dense<0.000000e+00> : vector<128x128xf32>
    %16 = tpu.matmul %14, %15, %cst_11 {dimension_numbers = #tpu.dot_dimension_numbers<[1], [1], [0], [0], [0, 0, 1, 0], [], []>} : vector<128x40xf32>, vector<128x40xf32>, vector<128x128xf32> -> vector<128x128xf32>
    %17 = vector.broadcast %2 : vector<1x128xi32> to vector<128x128xi32>
    %18 = vector.broadcast %3 : vector<128x1xi32> to vector<128x128xi32>
    %19 = arith.cmpi eq, %17, %18 : vector<128x128xi32>
    %cst_12 = arith.constant -1.000000e+30 : f32
    %20 = vector.broadcast %cst_12 : f32 to vector<128x128xf32>
    %21 = arith.select %19, %16, %20 : vector<128x128xi1>, vector<128x128xf32>
    %cst_13 = arith.constant dense<0xFF800000> : vector<128xf32>
    %22 = vector.multi_reduction <maximumf>, %21, %cst_13 [1] : vector<128x128xf32> to vector<128xf32>
    %23 = vector.shape_cast %22 : vector<128xf32> to vector<128x1xf32>
    %cst_14 = arith.constant 1.000000e+30 : f32
    %24 = vector.broadcast %cst_14 : f32 to vector<128x128xf32>
    %25 = arith.select %19, %24, %16 : vector<128x128xi1>, vector<128x128xf32>
    %26 = tpu.iota {dimensions = array<i32: 1>} : vector<128x128xi32>
    %cst_15 = arith.constant dense<0x7F800000> : vector<128xf32>
    %27 = vector.multi_reduction <minimumf>, %25, %cst_15 [1] : vector<128x128xf32> to vector<128xf32>
    %28 = vector.shape_cast %27 : vector<128xf32> to vector<128x1xf32>
    %29 = vector.broadcast %28 : vector<128x1xf32> to vector<128x128xf32>
    %30 = arith.cmpf oeq, %25, %29 : vector<128x128xf32>
    %c128_i32 = arith.constant 128 : i32
    %31 = vector.broadcast %c128_i32 : i32 to vector<128x128xi32>
    %32 = arith.select %30, %26, %31 : vector<128x128xi1>, vector<128x128xi32>
    %cst_16 = arith.constant dense<2147483647> : vector<128xi32>
    %33 = vector.multi_reduction <minsi>, %32, %cst_16 [1] : vector<128x128xi32> to vector<128xi32>
    %34 = vector.shape_cast %33 : vector<128xi32> to vector<128x1xi32>
    %35 = vector.broadcast %34 : vector<128x1xi32> to vector<128x128xi32>
    %36 = arith.cmpi eq, %26, %35 : vector<128x128xi32>
    %cst_17 = arith.constant 1.000000e+30 : f32
    %37 = vector.broadcast %cst_17 : f32 to vector<128x128xf32>
    %38 = arith.select %36, %37, %25 : vector<128x128xi1>, vector<128x128xf32>
    %cst_18 = arith.constant dense<0x7F800000> : vector<128xf32>
    %39 = vector.multi_reduction <minimumf>, %38, %cst_18 [1] : vector<128x128xf32> to vector<128xf32>
    %40 = vector.shape_cast %39 : vector<128xf32> to vector<128x1xf32>
    %41 = vector.broadcast %40 : vector<128x1xf32> to vector<128x128xf32>
    %42 = arith.cmpf oeq, %38, %41 : vector<128x128xf32>
    %c128_i32_19 = arith.constant 128 : i32
    %43 = vector.broadcast %c128_i32_19 : i32 to vector<128x128xi32>
    %44 = arith.select %42, %26, %43 : vector<128x128xi1>, vector<128x128xi32>
    %cst_20 = arith.constant dense<2147483647> : vector<128xi32>
    %45 = vector.multi_reduction <minsi>, %44, %cst_20 [1] : vector<128x128xi32> to vector<128xi32>
    %46 = vector.shape_cast %45 : vector<128xi32> to vector<128x1xi32>
    %cst_21 = arith.constant 9.99999996E-13 : f32
    %47 = vector.broadcast %cst_21 : f32 to vector<128x1xf32>
    %48 = arith.maximumf %23, %47 : vector<128x1xf32>
    %49 = math.sqrt %48 : vector<128x1xf32>
    %50 = vector.extract_strided_slice %34 {offsets = [0, 0], sizes = [32, 1], strides = [1, 1]} : vector<128x1xi32> to vector<32x1xi32>
    %51 = vector.extract_strided_slice %34 {offsets = [64, 0], sizes = [32, 1], strides = [1, 1]} : vector<128x1xi32> to vector<32x1xi32>
    %52 = vector.extract_strided_slice %34 {offsets = [32, 0], sizes = [32, 1], strides = [1, 1]} : vector<128x1xi32> to vector<32x1xi32>
    %53 = vector.extract_strided_slice %34 {offsets = [96, 0], sizes = [32, 1], strides = [1, 1]} : vector<128x1xi32> to vector<32x1xi32>
    %54 = tpu.concatenate %50, %51, %52, %53 in 0 : vector<32x1xi32>, vector<32x1xi32>, vector<32x1xi32>, vector<32x1xi32> -> vector<128x1xi32>
    %55 = vector.extract_strided_slice %46 {offsets = [0, 0], sizes = [32, 1], strides = [1, 1]} : vector<128x1xi32> to vector<32x1xi32>
    %56 = vector.extract_strided_slice %46 {offsets = [64, 0], sizes = [32, 1], strides = [1, 1]} : vector<128x1xi32> to vector<32x1xi32>
    %57 = vector.extract_strided_slice %46 {offsets = [32, 0], sizes = [32, 1], strides = [1, 1]} : vector<128x1xi32> to vector<32x1xi32>
    %58 = vector.extract_strided_slice %46 {offsets = [96, 0], sizes = [32, 1], strides = [1, 1]} : vector<128x1xi32> to vector<32x1xi32>
    %59 = tpu.concatenate %55, %56, %57, %58 in 0 : vector<32x1xi32>, vector<32x1xi32>, vector<32x1xi32>, vector<32x1xi32> -> vector<128x1xi32>
    %60 = tpu.iota {dimensions = array<i32: 1>} : vector<128x128xi32>
    %61 = vector.broadcast %54 : vector<128x1xi32> to vector<128x128xi32>
    %62 = arith.cmpi eq, %60, %61 : vector<128x128xi32>
    %63 = vector.broadcast %59 : vector<128x1xi32> to vector<128x128xi32>
    %64 = arith.cmpi eq, %60, %63 : vector<128x128xi32>
    %65 = arith.ori %62, %64 : vector<128x128xi1>
    %cst_22 = arith.constant 5.000000e-01 : f32
    %cst_23 = arith.constant 0.000000e+00 : f32
    %66 = vector.broadcast %cst_22 : f32 to vector<128x128xf32>
    %67 = vector.broadcast %cst_23 : f32 to vector<128x128xf32>
    %68 = arith.select %65, %66, %67 : vector<128x128xi1>, vector<128x128xf32>
    %cst_24 = arith.constant dense<0.000000e+00> : vector<128x32xf32>
    %69 = tpu.matmul %68, %0, %cst_24 {dimension_numbers = #tpu.dot_dimension_numbers<[1], [0], [0], [1], [0, 0, 1, 1], [], []>} : vector<128x128xf32>, vector<128x32xf32>, vector<128x32xf32> -> vector<128x32xf32>
    %70 = arith.subf %0, %69 : vector<128x32xf32>
    %71 = arith.mulf %70, %70 : vector<128x32xf32>
    %cst_25 = arith.constant dense<0.000000e+00> : vector<128xf32>
    %72 = vector.multi_reduction <add>, %71, %cst_25 [1] : vector<128x32xf32> to vector<128xf32>
    %73 = vector.shape_cast %72 : vector<128xf32> to vector<128x1xf32>
    %cst_26 = arith.constant 9.99999996E-13 : f32
    %74 = vector.broadcast %cst_26 : f32 to vector<128x1xf32>
    %75 = arith.maximumf %73, %74 : vector<128x1xf32>
    %76 = math.sqrt %75 : vector<128x1xf32>
    %77 = arith.subf %49, %76 : vector<128x1xf32>
    %cst_27 = arith.constant 3.000000e-01 : f32
    %78 = vector.broadcast %cst_27 : f32 to vector<128x1xf32>
    %79 = arith.addf %77, %78 : vector<128x1xf32>
    %cst_28 = arith.constant 0.000000e+00 : f32
    %80 = vector.broadcast %cst_28 : f32 to vector<128x1xf32>
    %81 = arith.maximumf %79, %80 : vector<128x1xf32>
    %cst_29 = arith.constant 1.562500e-02 : f32
    %82 = vector.broadcast %cst_29 : f32 to vector<128x1xf32>
    %83 = arith.mulf %81, %82 : vector<128x1xf32>
    %cst_30 = arith.constant 0.000000e+00 : f32
    %84 = vector.broadcast %cst_30 : f32 to vector<128x1xf32>
    %85 = arith.cmpf ogt, %79, %84 : vector<128x1xf32>
    %86 = arith.extui %85 : vector<128x1xi1> to vector<128x1xi32>
    %87 = arith.sitofp %86 : vector<128x1xi32> to vector<128x1xf32>
    %88 = tpu.concatenate %83, %87 in 1 : vector<128x1xf32>, vector<128x1xf32> -> vector<128x2xf32>
    %cst_31 = arith.constant dense<0.000000e+00> : vector<2xf32>
    %89 = vector.multi_reduction <add>, %88, %cst_31 [0] : vector<128x2xf32> to vector<2xf32>
    %90 = vector.shape_cast %89 : vector<2xf32> to vector<1x2xf32>
    %cst_32 = arith.constant 0.000000e+00 : f32
    %91 = vector.broadcast %cst_32 : f32 to vector<1x126xf32>
    %92 = tpu.concatenate %90, %91 in 1 : vector<1x2xf32>, vector<1x126xf32> -> vector<1x128xf32>
    %c0_33 = arith.constant 0 : index
    %c0_34 = arith.constant 0 : index
    %93 = vector.load %arg5[%c0_33, %c0_34] : memref<1x128xf32, #tpu.memory_space<vmem>>, vector<1x128xf32>
    tpu.vector_store %arg5[%c0_33, %c0_34], %92 {strides = array<i32>} : memref<1x128xf32, #tpu.memory_space<vmem>>, vector<1x128xf32>,
    return
  }
  func.func @transform_0(%arg0: i32) -> (i32, i32) {
    %c0_i32 = arith.constant 0 : i32
    %c0_i32_0 = arith.constant 0 : i32
    %c0_i32_1 = arith.constant 0 : i32
    return %c0_i32, %c0_i32_0 : i32, i32
  }
  func.func @transform_1(%arg0: i32) -> (i32, i32) {
    %c0_i32 = arith.constant 0 : i32
    %c0_i32_0 = arith.constant 0 : i32
    %c0_i32_1 = arith.constant 0 : i32
    return %c0_i32, %c0_i32_0 : i32, i32
  }
  func.func @transform_2(%arg0: i32) -> (i32, i32) {
    %c0_i32 = arith.constant 0 : i32
    %c0_i32_0 = arith.constant 0 : i32
    %c0_i32_1 = arith.constant 0 : i32
    return %c0_i32, %c0_i32_0 : i32, i32
  }
  func.func @transform_3(%arg0: i32) -> (i32, i32) {
    %c0_i32 = arith.constant 0 : i32
    %c0_i32_0 = arith.constant 0 : i32
    %c0_i32_1 = arith.constant 0 : i32
    return %c0_i32, %c0_i32_0 : i32, i32
  }
  func.func @transform_4(%arg0: i32) -> (i32, i32) {
    %c0_i32 = arith.constant 0 : i32
    %c0_i32_0 = arith.constant 0 : i32
    %c0_i32_1 = arith.constant 0 : i32
    return %c0_i32, %c0_i32_0 : i32, i32
  }
}

</mosaic_0001>

<bundles_post_ra>
// kernel: triplet_loss_balanced.1
= control target key start
LH: loop header
LB: loop body
LE: loop exit
PB: predicated region body
PF: predicated region fallthrough
CT: control target
= control target key end

     0   :  { %vm82_vm0 = vcmask 261120   ;;  %vm227_vm1 = vcmask 269312   ;;  %vm244_vm2 = vcmask 277504   ;;  %vm309_vm3 = vcmask 326656   ;;  %s4376_s1 = inlined_call_operand.vmem [shape: f32[128,32], index: 1, kind: input, shape index: {}]   ;;  %s4377_s0 = inlined_call_operand.vmem [shape: f32[128,32], index: 0, kind: input, shape index: {}]   ;;  %s4378_s3 = inlined_call_operand.vmem [shape: s32[128,1], index: 3, kind: input, shape index: {}]   ;;  %s4379_s2 = inlined_call_operand.vmem [shape: s32[1,128], index: 2, kind: input, shape index: {}]   ;;  %s4380_s4 = inlined_call_operand.vmem [shape: f32[1,128], index: 4, kind: output, shape index: {}]  }
   0x1   :  { %v2544_v0 = vld [vmem:[%s4376_s1] sm:$0xff]  ;;  %v2549_v1 = vld [vmem:[%s4376_s1 + $0x10] sm:$0xff]  ;;  %v2554_v2 = vld [vmem:[%s4376_s1 + $0x8] sm:$0xff] }
   0x2   :  { %v131_v3 = vmul.f32 %v2544_v0, %v2544_v0  ;;  %v133_v4 = vmul.f32 %v2549_v1, %v2549_v1  ;;  %v2563_v5 = vld [vmem:[%s4376_s1 + $0x18] sm:$0xff]  ;;  %v132_v6 = vmul.f32 %v2554_v2, %v2554_v2  ;;  %v2572_v8 = vld [vmem:[%s4376_s1 + $0x28] sm:$0xff]  ;;  %v2577_v9 = vld [vmem:[%s4376_s1 + $0x20] sm:$0xff] }
   0x3   :  { %v134_v7 = vmul.f32 %v2563_v5, %v2563_v5  ;;  %v136_v14 = vmul.f32 %v2572_v8, %v2572_v8  ;;  %v135_v15 = vmul.f32 %v2577_v9, %v2577_v9  ;;  %v2590_v16 = vld [vmem:[%s4376_s1 + $0x38] sm:$0xff]  ;;  %v2595_v17 = vld [vmem:[%s4376_s1 + $0x30] sm:$0xff]  ;;  %v2606_v22 = vld [vmem:[%s4376_s1 + $0x48] sm:$0xff] }
   0x4   :  { %v147_v10 = vsel %vm82_vm0, %v131_v3, 0.0  ;;  %v153_v11 = vsel %vm82_vm0, %v133_v4, 0.0  ;;  %v150_v12 = vsel %vm82_vm0, %v132_v6, 0.0  ;;  %v138_v20 = vmul.f32 %v2590_v16, %v2590_v16  ;;  %v2611_v23 = vld [vmem:[%s4376_s1 + $0x40] sm:$0xff]  ;;  %v2622_v28 = vld [vmem:[%s4376_s1 + $0x58] sm:$0xff]  ;;  %v2627_v29 = vld [vmem:[%s4376_s1 + $0x50] sm:$0xff] }
   0x5   :  { %148 = vadd.xlane.f32.xlu0 %v147_v10  ;;  %154 = vadd.xlane.f32.xlu1 %v153_v11  ;;  %v156_v13 = vsel %vm82_vm0, %v134_v7, 0.0  ;;  %v162_v18 = vsel %vm82_vm0, %v136_v14, 0.0  ;;  %v159_v19 = vsel %vm82_vm0, %v135_v15, 0.0  ;;  %v137_v21 = vmul.f32 %v2595_v17, %v2595_v17  ;;  %v2638_v34 = vld [vmem:[%s4376_s1 + $0x68] sm:$0xff]  ;;  %v2643_v35 = vld [vmem:[%s4376_s1 + $0x60] sm:$0xff]  ;;  %v2654_v40 = vld [vmem:[%s4376_s1 + $0x78] sm:$0xff] }
   0x6   :  { %v168_v24 = vsel %vm82_vm0, %v138_v20, 0.0  ;;  %v140_v26 = vmul.f32 %v2606_v22, %v2606_v22  ;;  %v139_v27 = vmul.f32 %v2611_v23, %v2611_v23  ;;  %v142_v32 = vmul.f32 %v2622_v28, %v2622_v28  ;;  %v2659_v41 = vld [vmem:[%s4376_s1 + $0x70] sm:$0xff]  ;;  %v2670_v46 = vld [vmem:[%s4377_s0] sm:$0xff]  ;;  %v2675_v47 = vld [vmem:[%s4377_s0 + $0x8] sm:$0xff] }
   0x7   :  { %v165_v25 = vsel %vm82_vm0, %v137_v21, 0.0  ;;  %v141_v33 = vmul.f32 %v2627_v29, %v2627_v29  ;;  %v144_v38 = vmul.f32 %v2638_v34, %v2638_v34  ;;  %v143_v39 = vmul.f32 %v2643_v35, %v2643_v35  ;;  %v2686_v52 = vld [vmem:[%s4377_s0 + $0x10] sm:$0xff]  ;;  %v2691_v53 = vld [vmem:[%s4377_s0 + $0x18] sm:$0xff]  ;;  %v2702_v58 = vld [vmem:[%s4377_s0 + $0x20] sm:$0xff] }
   0x8   :  { %v174_v30 = vsel %vm82_vm0, %v140_v26, 0.0  ;;  %v171_v31 = vsel %vm82_vm0, %v139_v27, 0.0  ;;  %v180_v36 = vsel %vm82_vm0, %v142_v32, 0.0  ;;  %v146_v44 = vmul.f32 %v2654_v40, %v2654_v40  ;;  %v2707_v59 = vld [vmem:[%s4377_s0 + $0x28] sm:$0xff]  ;;  %v2718_v3 = vld [vmem:[%s4377_s0 + $0x30] sm:$0xff]  ;;  %v2723_v4 = vld [vmem:[%s4377_s0 + $0x38] sm:$0xff] }
   0x9   :  { %151 = vadd.xlane.f32.xlu0 %v150_v12  ;;  %157 = vadd.xlane.f32.xlu1 %v156_v13  ;;  %v177_v37 = vsel %vm82_vm0, %v141_v33, 0.0  ;;  %v186_v42 = vsel %vm82_vm0, %v144_v38, 0.0  ;;  %v183_v43 = vsel %vm82_vm0, %v143_v39, 0.0  ;;  %v145_v45 = vmul.f32 %v2659_v41, %v2659_v41  ;;  %v2734_v12 = vld [vmem:[%s4377_s0 + $0x40] sm:$0xff]  ;;  %v2739_v13 = vld [vmem:[%s4377_s0 + $0x48] sm:$0xff]  ;;  %v2750_v20 = vld [vmem:[%s4377_s0 + $0x50] sm:$0xff] }
   0xa   :  { %v192_v48 = vsel %vm82_vm0, %v146_v44, 0.0  ;;  %v66_v50 = vmul.f32 %v2670_v46, %v2670_v46  ;;  %v67_v51 = vmul.f32 %v2675_v47, %v2675_v47  ;;  %v68_v56 = vmul.f32 %v2686_v52, %v2686_v52  ;;  %v2755_v21 = vld [vmem:[%s4377_s0 + $0x58] sm:$0xff]  ;;  %v2782_v38 = vld [vmem:[%s4377_s0 + $0x70] sm:$0xff]  ;;  %vm2859_vm4 = vmpackc.low %vm309_vm3, %vm309_vm3 }
   0xb   :  { %v189_v49 = vsel %vm82_vm0, %v145_v45, 0.0  ;;  %v69_v57 = vmul.f32 %v2691_v53, %v2691_v53  ;;  %v70_v62 = vmul.f32 %v2702_v58, %v2702_v58  ;;  %v71_v63 = vmul.f32 %v2707_v59, %v2707_v59  ;;  %v2787_v39 = vld [vmem:[%s4377_s0 + $0x78] sm:$0xff] }
   0xc   :  { %v83_v54 = vsel %vm82_vm0, %v66_v50, 0.0  ;;  %v86_v55 = vsel %vm82_vm0, %v67_v51, 0.0  ;;  %v89_v60 = vsel %vm82_vm0, %v68_v56, 0.0  ;;  %v72_v10 = vmul.f32 %v2718_v3, %v2718_v3  ;;  %v51_v51 = vld [vmem:[%s4378_s3 + $0x8] sm:$0xff] }
   0xd   :  { %163 = vadd.xlane.f32.xlu1 %v162_v18  ;;  %160 = vadd.xlane.f32.xlu0 %v159_v19  ;;  %v92_v61 = vsel %vm82_vm0, %v69_v57, 0.0  ;;  %v95_v6 = vsel %vm82_vm0, %v70_v62, 0.0  ;;  %v98_v7 = vsel %vm82_vm0, %v71_v63, 0.0  ;;  %v73_v11 = vmul.f32 %v2723_v4, %v2723_v4  ;;  %v55_v56 = vld [vmem:[%s4378_s3 + $0x28] sm:$0xff]  ;;  %v53_v57 = vld [vmem:[%s4378_s3 + $0x18] sm:$0xff] }
   0xe   :  { %v101_v14 = vsel %vm82_vm0, %v72_v10, 0.0  ;;  %v74_v18 = vmul.f32 %v2734_v12, %v2734_v12  ;;  %v75_v19 = vmul.f32 %v2739_v13, %v2739_v13  ;;  %v76_v26 = vmul.f32 %v2750_v20, %v2750_v20  ;;  %v63_v62 = vld [vmem:[%s4378_s3 + $0x68] sm:$0xff]  ;;  %v61_v10 = vld [vmem:[%s4378_s3 + $0x58] sm:$0xff] }
   0xf   :  { %v104_v15 = vsel %vm82_vm0, %v73_v11, 0.0  ;;  %v77_v27 = vmul.f32 %v2755_v21, %v2755_v21  ;;  %v80_v44 = vmul.f32 %v2782_v38, %v2782_v38  ;;  %v81_v45 = vmul.f32 %v2787_v39, %v2787_v39  ;;  %v59_v63 = vld [vmem:[%s4378_s3 + $0x48] sm:$0xff] }
  0x10   :  { %v113_v32 = vsel %vm82_vm0, %v76_v26, 0.0  ;;  %v2513_v50 = vmov 0   ;;  %v263_v11 = vsel %vm82_vm0, %v2549_v1, 1.0  ;;  %v264_v26 = vsel %vm82_vm0, %v2563_v5, 1.0 }
  0x11   :  { %169 = vadd.xlane.f32.xlu1 %v168_v24  ;;  %166 = vadd.xlane.f32.xlu0 %v165_v25  ;;  %v107_v24 = vsel %vm82_vm0, %v74_v18, 0.0  ;;  %v110_v25 = vsel %vm82_vm0, %v75_v19, 0.0  ;;  %v116_v33 = vsel %vm82_vm0, %v77_v27, 0.0  ;;  %v54_v19 = vld [vmem:[%s4378_s3 + $0x20] sm:$0xff]  ;;  %v266_v5 = vsel %vm82_vm0, %v2572_v8, 1.0 }
  0x12   :  { %2432 = vset.pattern.permute.xlu1 %v2513_v50  ;;  %2431 = vset.pattern.permute.xlu0 %v2513_v50 }
  0x15   :  { %175 = vadd.xlane.f32.xlu1 %v174_v30  ;;  %172 = vadd.xlane.f32.xlu0 %v171_v31  ;;  %v2766_v30 = vld [vmem:[%s4377_s0 + $0x60] sm:$0xff]  ;;  %v2771_v31 = vld [vmem:[%s4377_s0 + $0x68] sm:$0xff] }
  0x19   :  { %181 = vadd.xlane.f32.xlu1 %v180_v36  ;;  %178 = vadd.xlane.f32.xlu0 %v177_v37  ;;  %v78_v36 = vmul.f32 %v2766_v30, %v2766_v30  ;;  %v79_v37 = vmul.f32 %v2771_v31, %v2771_v31 }
  0x1d   :  { %187 = vadd.xlane.f32.xlu1 %v186_v42  ;;  %184 = vadd.xlane.f32.xlu0 %v183_v43  ;;  %v119_v42 = vsel %vm82_vm0, %v78_v36, 0.0  ;;  %v122_v43 = vsel %vm82_vm0, %v79_v37, 0.0 }
  0x21   :  { %193 = vadd.xlane.f32.xlu1 %v192_v48  ;;  %190 = vadd.xlane.f32.xlu0 %v189_v49  ;;  %v125_v48 = vsel %vm82_vm0, %v80_v44, 0.0  ;;  %v128_v49 = vsel %vm82_vm0, %v81_v45, 0.0  ;;  %v265_v45 = vsel %vm82_vm0, %v2577_v9, 1.0 }
  0x25   :  { %84 = vadd.xlane.f32.xlu0 %v83_v54  ;;  %87 = vadd.xlane.f32.xlu1 %v86_v55  ;;  %v52_v54 = vld [vmem:[%s4378_s3 + $0x10] sm:$0xff]  ;;  %v50_v55 = vld [vmem:[%s4378_s3] sm:$0xff] }
  0x29   :  { %90 = vadd.xlane.f32.xlu0 %v89_v60  ;;  %93 = vadd.xlane.f32.xlu1 %v92_v61  ;;  %v57_v60 = vld [vmem:[%s4378_s3 + $0x38] sm:$0xff]  ;;  %v58_v61 = vld [vmem:[%s4378_s3 + $0x40] sm:$0xff] }
  0x2d   :  { %96 = vadd.xlane.f32.xlu0 %v95_v6  ;;  %99 = vadd.xlane.f32.xlu1 %v98_v7  ;;  %v65_v6 = vld [vmem:[%s4378_s3 + $0x78] sm:$0xff]  ;;  %v60_v7 = vld [vmem:[%s4378_s3 + $0x50] sm:$0xff] }
  0x31   :  { %102 = vadd.xlane.f32.xlu0 %v101_v14  ;;  %105 = vadd.xlane.f32.xlu1 %v104_v15  ;;  %v261_v14 = vsel %vm82_vm0, %v2544_v0, 1.0 }
  0x35   :  { %108 = vadd.xlane.f32.xlu0 %v107_v24  ;;  %111 = vadd.xlane.f32.xlu1 %v110_v25  ;;  %v262_v25 = vsel %vm82_vm0, %v2554_v2, 1.0 }
  0x39   :  { %114 = vadd.xlane.f32.xlu0 %v113_v32  ;;  %117 = vadd.xlane.f32.xlu1 %v116_v33  ;;  %v56_v33 = vld [vmem:[%s4378_s3 + $0x30] sm:$0xff] }
  0x3d   :  { %120 = vadd.xlane.f32.xlu0 %v119_v42  ;;  %123 = vadd.xlane.f32.xlu1 %v122_v43 }
  0x41   :  { %126 = vadd.xlane.f32.xlu0 %v125_v48  ;;  %129 = vadd.xlane.f32.xlu1 %v128_v49 }
  0x52   :  { %559 = vperm.xlu1 %2432, %v51_v51   ;;  %v62_v51 = vld [vmem:[%s4378_s3 + $0x60] sm:$0xff] }
  0x56   :  { %562 = vperm.xlu1 %2432, %v52_v54  }
  0x57   :  { %556 = vperm.xlu0 %2431, %v50_v55  }
  0x5a   :  { %565 = vperm.xlu1 %2432, %v53_v57   ;;  %v268_v57 = vsel %vm82_vm0, %v2590_v16, 1.0 }
  0x5b   :  { %571 = vperm.xlu0 %2431, %v55_v56  }
  0x5e   :  { %580 = vperm.xlu1 %2432, %v58_v61  }
  0x5f   :  { %577 = vperm.xlu0 %2431, %v57_v60   ;;  %v267_v60 = vsel %vm82_vm0, %v2595_v17, 1.0  ;;  %v270_v17 = vsel %vm82_vm0, %v2606_v22, 1.0  ;;  %v272_v22 = vsel %vm82_vm0, %v2622_v28, 1.0  ;;  %v274_v28 = vsel %vm82_vm0, %v2638_v34, 1.0 }
  0x62   :  { %583 = vperm.xlu1 %2432, %v59_v63  }
  0x63   :  { %595 = vperm.xlu0 %2431, %v63_v62  }
  0x66   :  { %586 = vperm.xlu1 %2432, %v60_v7  }
  0x67   :  { %601 = vperm.xlu0 %2431, %v65_v6   ;;  %v64_v6 = vld [vmem:[%s4378_s3 + $0x70] sm:$0xff] }
  0x6a   :  { %589 = vperm.xlu1 %2432, %v61_v10  }
  0x6e   :  { %568 = vperm.xlu1 %2432, %v54_v19  }
  0x72   :  { %574 = vperm.xlu1 %2432, %v56_v33  }
  0x76   :  { %592 = vperm.xlu1 %2432, %v62_v51   ;;  %v195_v51 = vmul.f32 -2.0, %v2670_v46 }
  0x7a   :  { %598 = vperm.xlu1 %2432, %v64_v6  }
  0x92   :  { %v149_v15 = vpop.xlane.xlu0 %148  ;;  %v155_v18 = vpop.xlane.xlu1 %154 }
  0x93   :  { %v279_v24 = vsel %vm227_vm1, %v263_v11, %v155_v18  ;;  %v277_v1 = vsel %vm227_vm1, %v261_v14, %v149_v15  ;;  %v269_v14 = vsel %vm82_vm0, %v2611_v23, 1.0  ;;  %v271_v23 = vsel %vm82_vm0, %v2627_v29, 1.0 }
  0x94   :  { %v295_v0 = vsel %vm244_vm2, %v279_v24, 0.0  ;;  %v293_v42 = vsel %vm244_vm2, %v277_v1, 0.0  ;;  %v273_v29 = vsel %vm82_vm0, %v2643_v35, 1.0 }
  0x96   :  { %v152_v27 = vpop.xlane.xlu0 %151  ;;  %v158_v32 = vpop.xlane.xlu1 %157 }
  0x97   :  { %v278_v36 = vsel %vm227_vm1, %v262_v25, %v152_v27  ;;  %v280_v2 = vsel %vm227_vm1, %v264_v26, %v158_v32 }
  0x98   :  { %v296_v37 = vsel %vm244_vm2, %v280_v2, 0.0  ;;  %v294_v43 = vsel %vm244_vm2, %v278_v36, 0.0 }
  0x99   :  { %v2354_v48 = vpack.c.bf16 %v296_v37, %v295_v0  ;;  %v2348_v49 = vpack.c.bf16 %v294_v43, %v293_v42 }
  0x9a   :  { %v164_v50 = vpop.xlane.xlu1 %163  ;;  %v161_v8 = vpop.xlane.xlu0 %160 }
  0x9b   :  { %2350 = vmatprep.subr.msk.bf16.mxu0 %vm2859_vm4, %v2348_v49  ;;  %v282_v54 = vsel %vm227_vm1, %v266_v5, %v164_v50  ;;  %v281_v55 = vsel %vm227_vm1, %v265_v45, %v161_v8 }
  0x9c   :  { %2353 = vmatpush3.bf16.xpose.msk.msra.mxu0 %vm2859_vm4, %v2348_v49  ;;  %v298_v9 = vsel %vm244_vm2, %v282_v54, 0.0  ;;  %v297_v56 = vsel %vm244_vm2, %v281_v55, 0.0  ;;  %v196_v54 = vmul.f32 -2.0, %v2675_v47 }
  0x9d   :  { %2356 = vmatprep.subr.msk.bf16.mxu0 %vm2859_vm4, %v2354_v48  ;;  %v2360_v61 = vpack.c.bf16 %v298_v9, %v297_v56 }
  0x9e   :  { %v170_v62 = vpop.xlane.xlu1 %169  ;;  %v167_v63 = vpop.xlane.xlu0 %166 }
  0x9f   :  { %v284_v7 = vsel %vm227_vm1, %v268_v57, %v170_v62  ;;  %v283_v10 = vsel %vm227_vm1, %v267_v60, %v167_v63  ;;  %v197_v60 = vmul.f32 -2.0, %v2686_v52 }
  0xa0   :  { %v300_v16 = vsel %vm244_vm2, %v284_v7, 0.0  ;;  %v299_v11 = vsel %vm244_vm2, %v283_v10, 0.0  ;;  %v199_v10 = vmul.f32 -2.0, %v2702_v58  ;;  %v201_v58 = vmul.f32 -2.0, %v2718_v3 }
  0xa1   :  { %v2366_v15 = vpack.c.bf16 %v300_v16, %v299_v11  ;;  %v200_v16 = vmul.f32 -2.0, %v2707_v59  ;;  %v202_v59 = vmul.f32 -2.0, %v2723_v4 }
  0xa2   :  { %v176_v18 = vpop.xlane.xlu1 %175  ;;  %v173_v19 = vpop.xlane.xlu0 %172 }
  0xa3   :  { %v286_v24 = vsel %vm227_vm1, %v270_v17, %v176_v18  ;;  %v285_v25 = vsel %vm227_vm1, %v269_v14, %v173_v19 }
  0xa4   :  { %2359 = vmatpush3.bf16.xpose.msk.msra.mxu0 %vm2859_vm4, %v2354_v48  ;;  %v302_v26 = vsel %vm244_vm2, %v286_v24, 0.0  ;;  %v301_v1 = vsel %vm244_vm2, %v285_v25, 0.0 }
  0xa5   :  { %2362 = vmatprep.subr.msk.bf16.mxu0 %vm2859_vm4, %v2360_v61  ;;  %v2372_v0 = vpack.c.bf16 %v302_v26, %v301_v1 }
  0xa6   :  { %v182_v27 = vpop.xlane.xlu1 %181  ;;  %v179_v32 = vpop.xlane.xlu0 %178 }
  0xa7   :  { %v288_v33 = vsel %vm227_vm1, %v272_v22, %v182_v27  ;;  %v287_v36 = vsel %vm227_vm1, %v271_v23, %v179_v32  ;;  %v203_v32 = vmul.f32 -2.0, %v2734_v12  ;;  %v205_v12 = vmul.f32 -2.0, %v2750_v20 }
  0xa8   :  { %v304_v2 = vsel %vm244_vm2, %v288_v33, 0.0  ;;  %v303_v5 = vsel %vm244_vm2, %v287_v36, 0.0  ;;  %v204_v33 = vmul.f32 -2.0, %v2739_v13  ;;  %v276_v36 = vsel %vm82_vm0, %v2654_v40, 1.0 }
  0xa9   :  { %v2913_v37 = vpack.c.bf16 %v304_v2, %v303_v5  ;;  %v275_v2 = vsel %vm82_vm0, %v2659_v41, 1.0  ;;  %v206_v13 = vmul.f32 -2.0, %v2755_v21 }
  0xaa   :  { %v188_v42 = vpop.xlane.xlu1 %187  ;;  %v185_v43 = vpop.xlane.xlu0 %184 }
  0xab   :  { %v290_v45 = vsel %vm227_vm1, %v274_v28, %v188_v42  ;;  %v289_v48 = vsel %vm227_vm1, %v273_v29, %v185_v43 }
  0xac   :  { %2365 = vmatpush3.bf16.xpose.msk.msra.mxu0 %vm2859_vm4, %v2360_v61  ;;  %v306_v49 = vsel %vm244_vm2, %v290_v45, 0.0  ;;  %v305_v50 = vsel %vm244_vm2, %v289_v48, 0.0  ;;  %v198_v61 = vmul.f32 -2.0, %v2691_v53 }
  0xad   :  { %2368 = vmatprep.subr.msk.bf16.mxu0 %vm2859_vm4, %v2366_v15  ;;  %v2923_v34 = vpack.c.bf16 %v306_v49, %v305_v50 }
  0xae   :  { %v194_v35 = vpop.xlane.xlu1 %193  ;;  %v191_v8 = vpop.xlane.xlu0 %190 }
  0xaf   :  { %v292_v48 = vsel %vm227_vm1, %v276_v36, %v194_v35  ;;  %v291_v40 = vsel %vm227_vm1, %v275_v2, %v191_v8 }
  0xb0   :  { %v308_v35 = vsel %vm244_vm2, %v292_v48, 0.0  ;;  %v307_v8 = vsel %vm244_vm2, %v291_v40, 0.0 }
  0xb2   :  { %v85_v55 = vpop.xlane.xlu0 %84  ;;  %v88_v9 = vpop.xlane.xlu1 %87 }
  0xb3   :  { %v211_v56 = vsel %vm82_vm0, %v195_v51, %v85_v55  ;;  %v212_v57 = vsel %vm82_vm0, %v196_v54, %v88_v9 }
  0xb4   :  { %2371 = vmatpush3.bf16.xpose.msk.msra.mxu0 %vm2859_vm4, %v2366_v15  ;;  %v229_v62 = vsel %vm227_vm1, %v212_v57, 1.0  ;;  %v228_v63 = vsel %vm227_vm1, %v211_v56, 1.0  ;;  %v207_v56 = vmul.f32 -2.0, %v2766_v30  ;;  %v208_v57 = vmul.f32 -2.0, %v2771_v31 }
  0xb5   :  { %2374 = vmatprep.subr.msk.bf16.mxu0 %vm2859_vm4, %v2372_v0  ;;  %v245_v46 = vsel %vm244_vm2, %v228_v63, 0.0  ;;  %v2939_v47 = vsel %vm244_vm2, %v229_v62, 0.0  ;;  %v2390_v62 = vpack.c.bf16 %v308_v35, %v307_v8  ;;  %v210_v30 = vmul.f32 -2.0, %v2787_v39 }
  0xb6   :  { %2268 = vmatprep.mubr.msk.f32.mxu0 %vm309_vm3, %v245_v46  ;;  %v91_v52 = vpop.xlane.xlu0 %90  ;;  %v94_v6 = vpop.xlane.xlu1 %93 }
  0xb7   :  { %v213_v53 = vsel %vm82_vm0, %v197_v60, %v91_v52  ;;  %v214_v7 = vsel %vm82_vm0, %v198_v61, %v94_v6 }
  0xb8   :  { %v230_v11 = vsel %vm227_vm1, %v213_v53, 1.0  ;;  %v231_v17 = vsel %vm227_vm1, %v214_v7, 1.0 }
  0xb9   :  { %v2949_v14 = vsel %vm244_vm2, %v230_v11, 0.0  ;;  %v2952_v15 = vsel %vm244_vm2, %v231_v17, 0.0 }
  0xba   :  { %v97_v18 = vpop.xlane.xlu0 %96  ;;  %v100_v19 = vpop.xlane.xlu1 %99 }
  0xbb   :  { %v215_v24 = vsel %vm82_vm0, %v199_v10, %v97_v18  ;;  %v216_v25 = vsel %vm82_vm0, %v200_v16, %v100_v19  ;;  %v209_v10 = vmul.f32 -2.0, %v2782_v38 }
  0xbc   :  { %2377 = vmatpush3.bf16.xpose.msk.msra.mxu0 %vm2859_vm4, %v2372_v0  ;;  %v232_v26 = vsel %vm227_vm1, %v215_v24, 1.0  ;;  %v233_v1 = vsel %vm227_vm1, %v216_v25, 1.0 }
  0xbd   :  { %2380 = vmatprep.subr.msk.bf16.mxu0 %vm2859_vm4, %v2913_v37  ;;  %v2966_v22 = vsel %vm244_vm2, %v232_v26, 0.0  ;;  %v2969_v23 = vsel %vm244_vm2, %v233_v1, 0.0  ;;  %v3053_v1 = vld [vmem:[%s4379_s2] ss:$0 sm:$0xff] }
  0xbe   :  { %v103_v3 = vpop.xlane.xlu0 %102  ;;  %v106_v27 = vpop.xlane.xlu1 %105 }
  0xbf   :  { %v217_v4 = vsel %vm82_vm0, %v201_v58, %v103_v3  ;;  %v218_v0 = vsel %vm82_vm0, %v202_v59, %v106_v27 }
  0xc0   :  { %v234_v5 = vsel %vm227_vm1, %v217_v4, 1.0  ;;  %v235_v28 = vsel %vm227_vm1, %v218_v0, 1.0 }
  0xc1   :  { %v251_v29 = vsel %vm244_vm2, %v234_v5, 0.0  ;;  %v252_v42 = vsel %vm244_vm2, %v235_v28, 0.0 }
  0xc2   :  { %v109_v43 = vpop.xlane.xlu0 %108  ;;  %v112_v45 = vpop.xlane.xlu1 %111 }
  0xc3   :  { %v219_v41 = vsel %vm82_vm0, %v203_v32, %v109_v43  ;;  %v220_v49 = vsel %vm82_vm0, %v204_v33, %v112_v45 }
  0xc4   :  { %2383 = vmatpush3.bf16.xpose.msk.msra.mxu0 %vm2859_vm4, %v2913_v37  ;;  %v236_v50 = vsel %vm227_vm1, %v219_v41, 1.0  ;;  %v237_v51 = vsel %vm227_vm1, %v220_v49, 1.0 }
  0xc5   :  { %2386 = vmatprep.subr.msk.bf16.mxu0 %vm2859_vm4, %v2923_v34  ;;  %v253_v20 = vsel %vm244_vm2, %v236_v50, 0.0  ;;  %v254_v21 = vsel %vm244_vm2, %v237_v51, 0.0 }
  0xc6   :  { %v115_v54 = vpop.xlane.xlu0 %114  ;;  %v118_v55 = vpop.xlane.xlu1 %117 }
  0xc7   :  { %v221_v37 = vsel %vm82_vm0, %v205_v12, %v115_v54  ;;  %v222_v9 = vsel %vm82_vm0, %v206_v13, %v118_v55 }
  0xc8   :  { %v238_v60 = vsel %vm227_vm1, %v221_v37, 1.0  ;;  %v239_v61 = vsel %vm227_vm1, %v222_v9, 1.0 }
  0xc9   :  { %v255_v63 = vsel %vm244_vm2, %v238_v60, 0.0  ;;  %v256_v46 = vsel %vm244_vm2, %v239_v61, 0.0 }
  0xca   :  { %v121_v52 = vpop.xlane.xlu0 %120  ;;  %v124_v6 = vpop.xlane.xlu1 %123 }
  0xcb   :  { %v223_v53 = vsel %vm82_vm0, %v207_v56, %v121_v52  ;;  %v224_v7 = vsel %vm82_vm0, %v208_v57, %v124_v6 }
  0xcc   :  { %2389 = vmatpush3.bf16.xpose.msk.msra.mxu0 %vm2859_vm4, %v2923_v34  ;;  %v240_v31 = vsel %vm227_vm1, %v223_v53, 1.0  ;;  %v241_v16 = vsel %vm227_vm1, %v224_v7, 1.0 }
  0xcd   :  { %2392 = vmatprep.subr.msk.bf16.mxu0 %vm2859_vm4, %v2390_v62  ;;  %v257_v11 = vsel %vm244_vm2, %v240_v31, 0.0  ;;  %v258_v17 = vsel %vm244_vm2, %v241_v16, 0.0 }
  0xce   :  { %v127_v18 = vpop.xlane.xlu0 %126  ;;  %v130_v19 = vpop.xlane.xlu1 %129 }
  0xcf   :  { %v225_v38 = vsel %vm82_vm0, %v209_v10, %v127_v18  ;;  %v226_v39 = vsel %vm82_vm0, %v210_v30, %v130_v19 }
  0xd0   :  { %v242_v24 = vsel %vm227_vm1, %v225_v38, 1.0  ;;  %v243_v34 = vsel %vm227_vm1, %v226_v39, 1.0 }
  0xd1   :  { %v259_v25 = vsel %vm244_vm2, %v242_v24, 0.0  ;;  %v260_v58 = vsel %vm244_vm2, %v243_v34, 0.0 }
  0xd2   :  { %v560_v44 = vpop.permute.xlu1 %559 }
  0xd3   :  { %vm604_vm6 = vcmp.eq.s32.totalorder %v3053_v1, %v560_v44 }
  0xd4   :  { %2395 = vmatpush3.bf16.xpose.msk.msra.mxu0 %vm2859_vm4, %v2390_v62 }
  0xdb   :  { %2269 = vmatmul.mubr.msk.f32.vlgmr.msra.gmra.mrb[0].mxu0 %vm309_vm3, %v2939_v47  ;;  %v563_v47 = vpop.permute.xlu1 %562 }
  0xdc   :  { %2271 = vmatprep.mubr.msk.f32.mxu0 %vm309_vm3, %v2949_v14  ;;  %vm605_vm8 = vcmp.eq.s32.totalorder %v3053_v1, %v563_v47  ;;  %v683_v47 = vlaneseq }
  0xdf   :  { %2272 = vmatmul.mubr.msk.f32.gmra.mrb[2].mxu0 %vm309_vm3, %v2952_v15  ;;  %v566_v14 = vpop.permute.xlu1 %565 }
  0xe0   :  { %2274 = vmatprep.mubr.msk.f32.mxu0 %vm309_vm3, %v2966_v22  ;;  %v557_v22 = vpop.permute.xlu0 %556  ;;  %vm606_vm7 = vcmp.eq.s32.totalorder %v3053_v1, %v566_v14  ;;  %v3175_v14 = vand.u32 127, %v683_v47 }
  0xe1   :  { %vm603_vm5 = vcmp.eq.s32.totalorder %v3053_v1, %v557_v22 }
  0xe3   :  { %2275 = vmatmul.mubr.msk.f32.gmra.mrb[4].mxu0 %vm309_vm3, %v2969_v23  ;;  %v581_v15 = vpop.permute.xlu1 %580 }
  0xe4   :  { %2277 = vmatprep.mubr.msk.f32.mxu0 %vm309_vm3, %v251_v29  ;;  %v572_v2 = vpop.permute.xlu0 %571  ;;  %vm611_vm14 = vcmp.eq.s32.totalorder %v3053_v1, %v581_v15 }
  0xe5   :  { %vm608_vm9 = vcmp.eq.s32.totalorder %v3053_v1, %v572_v2 }
  0xe7   :  { %2278 = vmatmul.mubr.msk.f32.gmra.mrb[6].mxu0 %vm309_vm3, %v252_v42  ;;  %v584_v59 = vpop.permute.xlu1 %583 }
  0xe8   :  { %2280 = vmatprep.mubr.msk.f32.mxu0 %vm309_vm3, %v253_v20  ;;  %v578_v41 = vpop.permute.xlu0 %577  ;;  %vm612_vm13 = vcmp.eq.s32.totalorder %v3053_v1, %v584_v59 }
  0xe9   :  { %vm610_vm11 = vcmp.eq.s32.totalorder %v3053_v1, %v578_v41 }
  0xeb   :  { %2281 = vmatmul.mubr.msk.f32.gmra.mrb[8].mxu0 %vm309_vm3, %v254_v21  ;;  %v587_v26 = vpop.permute.xlu1 %586 }
  0xec   :  { %2283 = vmatprep.mubr.msk.f32.mxu0 %vm309_vm3, %v255_v63  ;;  %v596_v56 = vpop.permute.xlu0 %595  ;;  %vm613_vm1 = vcmp.eq.s32.totalorder %v3053_v1, %v587_v26 }
  0xed   :  { %vm616_vm2 = vcmp.eq.s32.totalorder %v3053_v1, %v596_v56 }
  0xef   :  { %2284 = vmatmul.mubr.msk.f32.gmra.mrb[10].mxu0 %vm309_vm3, %v256_v46  ;;  %v590_v23 = vpop.permute.xlu1 %589 }
  0xf0   :  { %2286 = vmatprep.mubr.msk.f32.mxu0 %vm309_vm3, %v257_v11  ;;  %vm614_vm15 = vcmp.eq.s32.totalorder %v3053_v1, %v590_v23  ;;  %v602_v53 = vpop.permute.xlu0 %601 }
  0xf1   :  { %vm618_vm4 = vcmp.eq.s32.totalorder %v3053_v1, %v602_v53 }
  0xf3   :  { %2287 = vmatmul.mubr.msk.f32.gmra.mrb[12].mxu0 %vm309_vm3, %v258_v17  ;;  %v569_v42 = vpop.permute.xlu1 %568 }
  0xf4   :  { %2289 = vmatprep.mubr.msk.f32.mxu0 %vm309_vm3, %v259_v25  ;;  %vm607_vm10 = vcmp.eq.s32.totalorder %v3053_v1, %v569_v42 }
  0xf7   :  { %2290 = vmatmul.mubr.msk.f32.gmra.mrb[14].mxu0 %vm309_vm3, %v260_v58  ;;  %v575_v49 = vpop.permute.xlu1 %574 }
  0xf8   :  { %vm609_vm12 = vcmp.eq.s32.totalorder %v3053_v1, %v575_v49 }
  0xfb   :  { %v593_v57 = vpop.permute.xlu1 %592 }
  0xfc   :  { %vm615_vm3 = vcmp.eq.s32.totalorder %v3053_v1, %v593_v57 }
  0xff   :  { %v599_v31 = vpop.permute.xlu1 %598 }
 0x1ae   :  { %v2270_v3 = vpop.f32.mrb[0].mxu0 }
 0x1af   :  { %v472_v27 = vpop.f32.mrb[1].mxu0  ;;  %v3057_v4 = vsel %vm604_vm6, 1e+30, %v2270_v3  ;;  %v3059_v0 = vsel %vm604_vm6, %v2270_v3, -1e+30 }
 0x1b0   :  { %687 = vmin.xlane.f32.xlu0 %v3057_v4  ;;  %v3062_v32 = vsel %vm603_vm5, 1e+30, %v472_v27  ;;  %v3064_v33 = vsel %vm603_vm5, %v472_v27, -1e+30  ;;  %vm617_vm5 = vcmp.eq.s32.totalorder %v3053_v1, %v599_v31 }
 0x1b1   :  { %685 = vmin.xlane.f32.xlu1 %v3062_v32 }
 0x1b2   :  { %v2273_v36 = vpop.f32.mrb[2].mxu0 }
 0x1b3   :  { %v482_v5 = vpop.f32.mrb[3].mxu0  ;;  %v3069_v28 = vsel %vm606_vm7, 1e+30, %v2273_v36  ;;  %v3071_v29 = vsel %vm606_vm7, %v2273_v36, -1e+30 }
 0x1b4   :  { %v3074_v43 = vsel %vm605_vm8, 1e+30, %v482_v5  ;;  %v3076_v45 = vsel %vm605_vm8, %v482_v5, -1e+30 }
 0x1b5   :  { %689 = vmin.xlane.f32.xlu0 %v3074_v43  ;;  %691 = vmin.xlane.f32.xlu1 %v3069_v28 }
 0x1b6   :  { %v2276_v12 = vpop.f32.mrb[4].mxu0 }
 0x1b7   :  { %v492_v13 = vpop.f32.mrb[5].mxu0  ;;  %v3083_v48 = vsel %vm608_vm9, %v2276_v12, -1e+30  ;;  %v3127_v10 = vsel %vm608_vm9, 1e+30, %v2276_v12 }
 0x1b8   :  { %4383 = vst [vmem:[#allocation2_spill] sm:$0xff] %v3083_v48  ;;  %v3087_v40 = vsel %vm607_vm10, %v492_v13, -1e+30  ;;  %v3136_v16 = vsel %vm607_vm10, 1e+30, %v492_v13 }
 0x1b9   :  { %4384 = vst [vmem:[#allocation3_spill] sm:$0xff] %v3087_v40 }
 0x1ba   :  { %v2279_v50 = vpop.f32.mrb[6].mxu0 }
 0x1bb   :  { %v502_v51 = vpop.f32.mrb[7].mxu0  ;;  %v3093_v20 = vsel %vm610_vm11, %v2279_v50, -1e+30  ;;  %v3147_v19 = vsel %vm610_vm11, 1e+30, %v2279_v50 }
 0x1bc   :  { %4385 = vst [vmem:[#allocation4_spill] sm:$0xff] %v3093_v20  ;;  %v3097_v21 = vsel %vm609_vm12, %v502_v51, -1e+30  ;;  %v3156_v24 = vsel %vm609_vm12, 1e+30, %v502_v51 }
 0x1bd   :  { %4386 = vst [vmem:[#allocation5_spill] sm:$0xff] %v3097_v21 }
 0x1be   :  { %v2282_v35 = vpop.f32.mrb[8].mxu0 }
 0x1bf   :  { %v512_v8 = vpop.f32.mrb[9].mxu0  ;;  %v3101_v54 = vsel %vm612_vm13, 1e+30, %v2282_v35  ;;  %v3103_v55 = vsel %vm612_vm13, %v2282_v35, -1e+30 }
 0x1c0   :  { %4387 = vst [vmem:[#allocation6_spill] sm:$0xff] %v3103_v55  ;;  %703 = vmin.xlane.f32.xlu1 %v3101_v54  ;;  %v3106_v37 = vsel %vm611_vm14, 1e+30, %v512_v8  ;;  %v3108_v9 = vsel %vm611_vm14, %v512_v8, -1e+30 }
 0x1c1   :  { %4388 = vst [vmem:[#allocation7_spill] sm:$0xff] %v3108_v9  ;;  %701 = vmin.xlane.f32.xlu0 %v3106_v37 }
 0x1c2   :  { %v2285_v60 = vpop.f32.mrb[10].mxu0 }
 0x1c3   :  { %v522_v61 = vpop.f32.mrb[11].mxu0  ;;  %v3113_v62 = vsel %vm614_vm15, 1e+30, %v2285_v60  ;;  %v3115_v63 = vsel %vm614_vm15, %v2285_v60, -1e+30 }
 0x1c4   :  { %4389 = vst [vmem:[#allocation8_spill] sm:$0xff] %v3115_v63  ;;  %707 = vmin.xlane.f32.xlu1 %v3113_v62  ;;  %v3118_v46 = vsel %vm613_vm1, 1e+30, %v522_v61  ;;  %v3120_v52 = vsel %vm613_vm1, %v522_v61, -1e+30 }
 0x1c5   :  { %4390 = vst [vmem:[#allocation9_spill] sm:$0xff] %v3120_v52  ;;  %705 = vmin.xlane.f32.xlu0 %v3118_v46 }
 0x1c6   :  { %v2288_v6 = vpop.f32.mrb[12].mxu0 }
 0x1c7   :  { %v532_v7 = vpop.f32.mrb[13].mxu0  ;;  %v3131_v30 = vsel %vm616_vm2, %v2288_v6, -1e+30  ;;  %v3161_v34 = vsel %vm616_vm2, 1e+30, %v2288_v6 }
 0x1c8   :  { %4391 = vst [vmem:[#allocation10_spill] sm:$0xff] %v3131_v30  ;;  %695 = vmin.xlane.f32.xlu1 %v3127_v10  ;;  %v3140_v11 = vsel %vm615_vm3, %v532_v7, -1e+30  ;;  %v3166_v25 = vsel %vm615_vm3, 1e+30, %v532_v7 }
 0x1c9   :  { %4392 = vst [vmem:[#allocation11_spill] sm:$0xff] %v3140_v11  ;;  %693 = vmin.xlane.f32.xlu0 %v3136_v16 }
 0x1ca   :  { %v2291_v17 = vpop.f32.mrb[14].mxu0 }
 0x1cb   :  { %v542_v18 = vpop.f32.mrb[15].mxu0  ;;  %v3149_v38 = vsel %vm618_vm4, %v2291_v17, -1e+30  ;;  %v3169_v58 = vsel %vm618_vm4, 1e+30, %v2291_v17 }
 0x1cc   :  { %4393 = vst [vmem:[#allocation12_spill] sm:$0xff] %v3149_v38  ;;  %v3151_v39 = vsel %vm617_vm5, %v542_v18, -1e+30  ;;  %699 = vmin.xlane.f32.xlu1 %v3147_v19  ;;  %v3171_v44 = vsel %vm617_vm5, 1e+30, %v542_v18 }
 0x1cd   :  { %4394 = vst [vmem:[#allocation13_spill] sm:$0xff] %v3151_v39  ;;  %697 = vmin.xlane.f32.xlu0 %v3156_v24 }
 0x1d0   :  { %711 = vmin.xlane.f32.xlu1 %v3161_v34 }
 0x1d1   :  { %709 = vmin.xlane.f32.xlu0 %v3166_v25 }
 0x1d4   :  { %715 = vmin.xlane.f32.xlu1 %v3169_v58 }
 0x1d5   :  { %713 = vmin.xlane.f32.xlu0 %v3171_v44 }
 0x23d   :  { %v688_v15 = vpop.xlane.xlu0 %687 }
 0x23e   :  { %vm718_vm6 = vcmp.eq.f32.partialorder %v3057_v4, %v688_v15  ;;  %v686_v59 = vpop.xlane.xlu1 %685 }
 0x23f   :  { %v3179_v26 = vsel %vm718_vm6, %v3175_v14, 128  ;;  %vm717_vm7 = vcmp.eq.f32.partialorder %v3062_v32, %v686_v59 }
 0x240   :  { %v3183_v1 = vsel %vm717_vm7, %v3175_v14, 128  ;;  %v764_v22 = vshra.s32 %v3179_v26, 16 }
 0x241   :  { %v750_v23 = vshra.s32 %v3183_v1, 16 }
 0x242   :  { %v692_v3 = vpop.xlane.xlu1 %691  ;;  %v690_v27 = vpop.xlane.xlu0 %689  ;;  %v3187_v36 = vcvt.s32.f32 %v764_v22 }
 0x243   :  { %vm720_vm8 = vcmp.eq.f32.partialorder %v3069_v28, %v692_v3  ;;  %vm719_vm9 = vcmp.eq.f32.partialorder %v3074_v43, %v690_v27  ;;  %v3191_v2 = vcvt.s32.f32 %v750_v23 }
 0x244   :  { %v3194_v5 = vsel %vm720_vm8, %v3175_v14, 128  ;;  %v3197_v42 = vsel %vm719_vm9, %v3175_v14, 128  ;;  %767 = vmin.xlane.f32.xlu1 %v3187_v36 }
 0x245   :  { %753 = vmin.xlane.f32.xlu0 %v3191_v2  ;;  %v792_v12 = vshra.s32 %v3194_v5, 16  ;;  %v778_v13 = vshra.s32 %v3197_v42, 16  ;;  %v777_v20 = vand.u32 65535, %v3197_v42 }
 0x247   :  { %v3203_v41 = vcvt.s32.f32 %v792_v12  ;;  %v3205_v49 = vcvt.s32.f32 %v778_v13  ;;  %v779_v40 = vcvt.s32.f32 %v777_v20 }
 0x249   :  { %795 = vmin.xlane.f32.xlu1 %v3203_v41  ;;  %781 = vmin.xlane.f32.xlu0 %v3205_v49 }
 0x24d   :  { %v704_v50 = vpop.xlane.xlu1 %703 }
 0x24e   :  { %vm726_vm10 = vcmp.eq.f32.partialorder %v3101_v54, %v704_v50  ;;  %v702_v51 = vpop.xlane.xlu0 %701 }
 0x24f   :  { %v3211_v35 = vsel %vm726_vm10, %v3175_v14, 128  ;;  %vm725_vm11 = vcmp.eq.f32.partialorder %v3106_v37, %v702_v51 }
 0x250   :  { %v3215_v8 = vsel %vm725_vm11, %v3175_v14, 128  ;;  %v876_v56 = vshra.s32 %v3211_v35, 16 }
 0x251   :  { %v708_v57 = vpop.xlane.xlu1 %707  ;;  %v862_v60 = vshra.s32 %v3215_v8, 16 }
 0x252   :  { %vm728_vm12 = vcmp.eq.f32.partialorder %v3113_v62, %v708_v57  ;;  %v706_v61 = vpop.xlane.xlu0 %705  ;;  %v3220_v6 = vcvt.s32.f32 %v876_v56 }
 0x253   :  { %v3223_v53 = vsel %vm728_vm12, %v3175_v14, 128  ;;  %vm727_vm13 = vcmp.eq.f32.partialorder %v3118_v46, %v706_v61  ;;  %v3226_v7 = vcvt.s32.f32 %v862_v60 }
 0x254   :  { %v3229_v31 = vsel %vm727_vm13, %v3175_v14, 128  ;;  %879 = vmin.xlane.f32.xlu1 %v3220_v6  ;;  %v904_v17 = vshra.s32 %v3223_v53, 16 }
 0x255   :  { %v696_v18 = vpop.xlane.xlu1 %695  ;;  %865 = vmin.xlane.f32.xlu0 %v3226_v7  ;;  %v890_v47 = vshra.s32 %v3229_v31, 16 }
 0x256   :  { %vm722_vm14 = vcmp.eq.f32.partialorder %v3127_v10, %v696_v18  ;;  %v694_v15 = vpop.xlane.xlu0 %693  ;;  %v3236_v59 = vcvt.s32.f32 %v904_v17 }
 0x257   :  { %v3239_v22 = vsel %vm722_vm14, %v3175_v14, 128  ;;  %vm721_vm15 = vcmp.eq.f32.partialorder %v3136_v16, %v694_v15  ;;  %v3242_v23 = vcvt.s32.f32 %v890_v47 }
 0x258   :  { %v3245_v3 = vsel %vm721_vm15, %v3175_v14, 128  ;;  %907 = vmin.xlane.f32.xlu1 %v3236_v59  ;;  %v820_v27 = vshra.s32 %v3239_v22, 16 }
 0x259   :  { %v700_v12 = vpop.xlane.xlu1 %699  ;;  %893 = vmin.xlane.f32.xlu0 %v3242_v23  ;;  %v806_v13 = vshra.s32 %v3245_v3, 16 }
 0x25a   :  { %vm724_vm1 = vcmp.eq.f32.partialorder %v3147_v19, %v700_v12  ;;  %v698_v50 = vpop.xlane.xlu0 %697  ;;  %v3252_v51 = vcvt.s32.f32 %v820_v27 }
 0x25b   :  { %v3255_v56 = vsel %vm724_vm1, %v3175_v14, 128  ;;  %vm723_vm2 = vcmp.eq.f32.partialorder %v3156_v24, %v698_v50  ;;  %v3258_v57 = vcvt.s32.f32 %v806_v13 }
 0x25c   :  { %v3261_v60 = vsel %vm723_vm2, %v3175_v14, 128  ;;  %823 = vmin.xlane.f32.xlu1 %v3252_v51  ;;  %v848_v61 = vshra.s32 %v3255_v56, 16 }
 0x25d   :  { %v712_v17 = vpop.xlane.xlu1 %711  ;;  %809 = vmin.xlane.f32.xlu0 %v3258_v57  ;;  %v834_v18 = vshra.s32 %v3261_v60, 16 }
 0x25e   :  { %vm730_vm3 = vcmp.eq.f32.partialorder %v3161_v34, %v712_v17  ;;  %v710_v47 = vpop.xlane.xlu0 %709  ;;  %v3268_v15 = vcvt.s32.f32 %v848_v61 }
 0x25f   :  { %v3271_v27 = vsel %vm730_vm3, %v3175_v14, 128  ;;  %vm729_vm4 = vcmp.eq.f32.partialorder %v3166_v25, %v710_v47  ;;  %v3274_v12 = vcvt.s32.f32 %v834_v18 }
 0x260   :  { %v3277_v13 = vsel %vm729_vm4, %v3175_v14, 128  ;;  %851 = vmin.xlane.f32.xlu1 %v3268_v15  ;;  %v932_v50 = vshra.s32 %v3271_v27, 16 }
 0x261   :  { %v716_v38 = vpop.xlane.xlu1 %715  ;;  %837 = vmin.xlane.f32.xlu0 %v3274_v12  ;;  %v918_v61 = vshra.s32 %v3277_v13, 16 }
 0x262   :  { %vm732_vm5 = vcmp.eq.f32.partialorder %v3169_v58, %v716_v38  ;;  %v714_v17 = vpop.xlane.xlu0 %713  ;;  %v3284_v39 = vcvt.s32.f32 %v932_v50 }
 0x263   :  { %v3287_v18 = vsel %vm732_vm5, %v3175_v14, 128  ;;  %vm731_vm6 = vcmp.eq.f32.partialorder %v3171_v44, %v714_v17  ;;  %v3290_v47 = vcvt.s32.f32 %v918_v61  ;;  %v763_v61 = vand.u32 65535, %v3179_v26 }
 0x264   :  { %v3293_v30 = vsel %vm731_vm6, %v3175_v14, 128  ;;  %935 = vmin.xlane.f32.xlu1 %v3284_v39  ;;  %v960_v11 = vshra.s32 %v3287_v18, 16  ;;  %v749_v17 = vand.u32 65535, %v3183_v1 }
 0x265   :  { %921 = vmin.xlane.f32.xlu0 %v3290_v47  ;;  %v946_v38 = vshra.s32 %v3293_v30, 16  ;;  %v765_v55 = vcvt.s32.f32 %v763_v61 }
 0x266   :  { %v3299_v50 = vcvt.s32.f32 %v960_v11  ;;  %v751_v11 = vcvt.s32.f32 %v749_v17  ;;  %v903_v17 = vand.u32 65535, %v3223_v53  ;;  %v819_v53 = vand.u32 65535, %v3239_v22 }
 0x267   :  { %v3301_v63 = vcvt.s32.f32 %v946_v38  ;;  %v791_v38 = vand.u32 65535, %v3194_v5  ;;  %v847_v22 = vand.u32 65535, %v3255_v56 }
 0x268   :  { %963 = vmin.xlane.f32.xlu1 %v3299_v50 }
 0x269   :  { %949 = vmin.xlane.f32.xlu0 %v3301_v63  ;;  %v793_v48 = vcvt.s32.f32 %v791_v38  ;;  %v849_v56 = vcvt.s32.f32 %v847_v22 }
 0x2d1   :  { %v3307_v52 = vpop.xlane.xlu1 %767 }
 0x2d2   :  { %v3309_v9 = vpop.xlane.xlu0 %753  ;;  %vm769_vm7 = vcmp.eq.f32.partialorder %v3187_v36, %v3307_v52 }
 0x2d3   :  { %v770_v21 = vsel %vm769_vm7, %v765_v55, inf  ;;  %vm755_vm8 = vcmp.eq.f32.partialorder %v3191_v2, %v3309_v9  ;;  %v861_v2 = vand.u32 65535, %v3215_v8  ;;  %v905_v8 = vcvt.s32.f32 %v903_v17 }
 0x2d4   :  { %771 = vmin.xlane.f32.xlu1 %v770_v21  ;;  %v756_v26 = vsel %vm755_vm8, %v751_v11, inf  ;;  %v875_v21 = vand.u32 65535, %v3211_v35 }
 0x2d5   :  { %757 = vmin.xlane.f32.xlu0 %v756_v26 }
 0x2d6   :  { %v3317_v1 = vpop.xlane.xlu1 %795  ;;  %v3319_v61 = vpop.xlane.xlu0 %781  ;;  %v877_v42 = vcvt.s32.f32 %v875_v21 }
 0x2d7   :  { %vm797_vm9 = vcmp.eq.f32.partialorder %v3203_v41, %v3317_v1  ;;  %vm783_vm10 = vcmp.eq.f32.partialorder %v3205_v49, %v3319_v61  ;;  %v863_v41 = vcvt.s32.f32 %v861_v2  ;;  %v931_v2 = vand.u32 65535, %v3271_v27 }
 0x2d8   :  { %v798_v36 = vsel %vm797_vm9, %v793_v48, inf  ;;  %v784_v55 = vsel %vm783_vm10, %v779_v40, inf  ;;  %v889_v48 = vand.u32 65535, %v3229_v31  ;;  %v805_v31 = vand.u32 65535, %v3245_v3 }
 0x2d9   :  { %799 = vmin.xlane.f32.xlu1 %v798_v36  ;;  %785 = vmin.xlane.f32.xlu0 %v784_v55  ;;  %v821_v36 = vcvt.s32.f32 %v819_v53  ;;  %v833_v3 = vand.u32 65535, %v3261_v60  ;;  %v917_v60 = vand.u32 65535, %v3277_v13  ;;  %v959_v27 = vand.u32 65535, %v3287_v18 }
 0x2da   :  { %v945_v13 = vand.u32 65535, %v3293_v30  ;;  %v802_v22 = vcvt.f32.s32 %v3317_v1 }
 0x2db   :  { %v961_v18 = vcvt.s32.f32 %v959_v27 }
 0x2e1   :  { %v3327_v5 = vpop.xlane.xlu1 %879 }
 0x2e2   :  { %v3330_v20 = vpop.xlane.xlu0 %865  ;;  %vm881_vm11 = vcmp.eq.f32.partialorder %v3220_v6, %v3327_v5  ;;  %v891_v6 = vcvt.s32.f32 %v889_v48 }
 0x2e3   :  { %v882_v40 = vsel %vm881_vm11, %v877_v42, inf  ;;  %vm867_vm12 = vcmp.eq.f32.partialorder %v3226_v7, %v3330_v20 }
 0x2e4   :  { %883 = vmin.xlane.f32.xlu1 %v882_v40  ;;  %v868_v49 = vsel %vm867_vm12, %v863_v41, inf  ;;  %v933_v40 = vcvt.s32.f32 %v931_v2 }
 0x2e5   :  { %v3337_v35 = vpop.xlane.xlu1 %907  ;;  %869 = vmin.xlane.f32.xlu0 %v868_v49 }
 0x2e6   :  { %v3340_v11 = vpop.xlane.xlu0 %893  ;;  %vm909_vm13 = vcmp.eq.f32.partialorder %v3236_v59, %v3337_v35  ;;  %v807_v59 = vcvt.s32.f32 %v805_v31  ;;  %v947_v31 = vcvt.s32.f32 %v945_v13 }
 0x2e7   :  { %v910_v38 = vsel %vm909_vm13, %v905_v8, inf  ;;  %vm895_vm14 = vcmp.eq.f32.partialorder %v3242_v23, %v3340_v11 }
 0x2e8   :  { %911 = vmin.xlane.f32.xlu1 %v910_v38  ;;  %v896_v7 = vsel %vm895_vm14, %v891_v6, inf  ;;  %v760_v38 = vcvt.f32.s32 %v3309_v9 }
 0x2e9   :  { %v3347_v26 = vpop.xlane.xlu1 %823  ;;  %897 = vmin.xlane.f32.xlu0 %v896_v7 }
 0x2ea   :  { %v3350_v55 = vpop.xlane.xlu0 %809  ;;  %vm825_vm15 = vcmp.eq.f32.partialorder %v3252_v51, %v3347_v26  ;;  %v835_v51 = vcvt.s32.f32 %v833_v3 }
 0x2eb   :  { %v826_v21 = vsel %vm825_vm15, %v821_v36, inf  ;;  %vm811_vm1 = vcmp.eq.f32.partialorder %v3258_v57, %v3350_v55 }
 0x2ec   :  { %827 = vmin.xlane.f32.xlu1 %v826_v21  ;;  %v812_v23 = vsel %vm811_vm1, %v807_v59, inf  ;;  %v788_v59 = vcvt.f32.s32 %v3319_v61  ;;  %v761_v21 = vshll.u32 %v760_v38, 16 }
 0x2ed   :  { %v3358_v42 = vpop.xlane.xlu1 %851  ;;  %813 = vmin.xlane.f32.xlu0 %v812_v23 }
 0x2ee   :  { %v3360_v17 = vpop.xlane.xlu0 %837  ;;  %vm853_vm2 = vcmp.eq.f32.partialorder %v3268_v15, %v3358_v42  ;;  %v919_v15 = vcvt.s32.f32 %v917_v60 }
 0x2ef   :  { %v854_v41 = vsel %vm853_vm2, %v849_v56, inf  ;;  %vm839_vm3 = vcmp.eq.f32.partialorder %v3274_v12, %v3360_v17  ;;  %v803_v56 = vshll.u32 %v802_v22, 16 }
 0x2f0   :  { %855 = vmin.xlane.f32.xlu1 %v854_v41  ;;  %v840_v57 = vsel %vm839_vm3, %v835_v51, inf  ;;  %v789_v51 = vshll.u32 %v788_v59, 16 }
 0x2f1   :  { %v3368_v48 = vpop.xlane.xlu1 %935  ;;  %841 = vmin.xlane.f32.xlu0 %v840_v57 }
 0x2f2   :  { %v3370_v49 = vpop.xlane.xlu0 %921  ;;  %vm937_vm4 = vcmp.eq.f32.partialorder %v3284_v39, %v3368_v48 }
 0x2f3   :  { %v938_v8 = vsel %vm937_vm4, %v933_v40, inf  ;;  %vm923_vm5 = vcmp.eq.f32.partialorder %v3290_v47, %v3370_v49  ;;  %v774_v47 = vcvt.f32.s32 %v3307_v52 }
 0x2f4   :  { %939 = vmin.xlane.f32.xlu1 %v938_v8  ;;  %v924_v12 = vsel %vm923_vm5, %v919_v15, inf  ;;  %v872_v15 = vcvt.f32.s32 %v3330_v20  ;;  %v816_v20 = vcvt.f32.s32 %v3350_v55 }
 0x2f5   :  { %v3377_v53 = vpop.xlane.xlu1 %963  ;;  %925 = vmin.xlane.f32.xlu0 %v924_v12  ;;  %v775_v36 = vshll.u32 %v774_v47, 16  ;;  %v914_v12 = vcvt.f32.s32 %v3337_v35  ;;  %v830_v47 = vcvt.f32.s32 %v3347_v26 }
 0x2f6   :  { %v3379_v6 = vpop.xlane.xlu0 %949  ;;  %vm965_vm6 = vcmp.eq.f32.partialorder %v3299_v50, %v3377_v53 }
 0x2f7   :  { %v966_v39 = vsel %vm965_vm6, %v961_v18, inf  ;;  %vm951_vm7 = vcmp.eq.f32.partialorder %v3301_v63, %v3379_v6  ;;  %v831_v55 = vshll.u32 %v830_v47, 16 }
 0x2f8   :  { %967 = vmin.xlane.f32.xlu1 %v966_v39  ;;  %v952_v30 = vsel %vm951_vm7, %v947_v31, inf  ;;  %v873_v39 = vshll.u32 %v872_v15, 16 }
 0x2f9   :  { %953 = vmin.xlane.f32.xlu0 %v952_v30 }
 0x361   :  { %v772_v7 = vpop.xlane.xlu1 %771 }
 0x362   :  { %v773_v3 = vcvt.f32.s32 %v772_v7  ;;  %v758_v50 = vpop.xlane.xlu0 %757 }
 0x363   :  { %v759_v23 = vcvt.f32.s32 %v758_v50 }
 0x364   :  { %v3389_v2 = vadd.s32 %v775_v36, %v773_v3 }
 0x365   :  { %v3391_v63 = vadd.s32 %v761_v21, %v759_v23  ;;  %v817_v23 = vshll.u32 %v816_v20, 16 }
 0x366   :  { %v800_v60 = vpop.xlane.xlu1 %799  ;;  %v786_v52 = vpop.xlane.xlu0 %785  ;;  %vm974_vm8 = vcmp.eq.s32.totalorder %v3175_v14, %v3389_v2 }
 0x367   :  { %v801_v9 = vcvt.f32.s32 %v800_v60  ;;  %v787_v41 = vcvt.f32.s32 %v786_v52  ;;  %v3396_v1 = vsel %vm974_vm8, 1e+30, %v3057_v4  ;;  %vm973_vm9 = vcmp.eq.s32.totalorder %v3175_v14, %v3391_v63 }
 0x368   :  { %1007 = vmin.xlane.f32.xlu1 %v3396_v1  ;;  %v3402_v61 = vsel %vm973_vm9, 1e+30, %v3062_v32  ;;  %v886_v32 = vcvt.f32.s32 %v3327_v5  ;;  %v915_v5 = vshll.u32 %v914_v12, 16  ;;  %v844_v60 = vcvt.f32.s32 %v3360_v17 }
 0x369   :  { %v3404_v57 = vadd.s32 %v803_v56, %v801_v9  ;;  %1005 = vmin.xlane.f32.xlu0 %v3402_v61  ;;  %v3407_v27 = vadd.s32 %v789_v51, %v787_v41  ;;  %v942_v41 = vcvt.f32.s32 %v3368_v48 }
 0x36a   :  { %v887_v8 = vshll.u32 %v886_v32, 16  ;;  %v845_v12 = vshll.u32 %v844_v60, 16 }
 0x36b   :  { %vm976_vm10 = vcmp.eq.s32.totalorder %v3175_v14, %v3404_v57  ;;  %vm975_vm11 = vcmp.eq.s32.totalorder %v3175_v14, %v3407_v27 }
 0x36c   :  { %v3414_v4 = vsel %vm976_vm10, 1e+30, %v3069_v28  ;;  %v3417_v40 = vsel %vm975_vm11, 1e+30, %v3074_v43  ;;  %v900_v28 = vcvt.f32.s32 %v3340_v11 }
 0x36d   :  { %1011 = vmin.xlane.f32.xlu1 %v3414_v4  ;;  %1009 = vmin.xlane.f32.xlu0 %v3417_v40 }
 0x36e   :  { %v901_v35 = vshll.u32 %v900_v28, 16 }
 0x371   :  { %v884_v13 = vpop.xlane.xlu1 %883 }
 0x372   :  { %v885_v18 = vcvt.f32.s32 %v884_v13  ;;  %v870_v31 = vpop.xlane.xlu0 %869 }
 0x373   :  { %v871_v30 = vcvt.f32.s32 %v870_v31 }
 0x374   :  { %v3425_v43 = vadd.s32 %v887_v8, %v885_v18 }
 0x375   :  { %v912_v38 = vpop.xlane.xlu1 %911  ;;  %v3428_v7 = vadd.s32 %v873_v39, %v871_v30 }
 0x376   :  { %v913_v36 = vcvt.f32.s32 %v912_v38  ;;  %v898_v22 = vpop.xlane.xlu0 %897  ;;  %vm982_vm12 = vcmp.eq.s32.totalorder %v3175_v14, %v3425_v43 }
 0x377   :  { %v899_v59 = vcvt.f32.s32 %v898_v22  ;;  %v3434_v11 = vsel %vm982_vm12, 1e+30, %v3101_v54  ;;  %vm981_vm13 = vcmp.eq.s32.totalorder %v3175_v14, %v3428_v7  ;;  %v858_v54 = vcvt.f32.s32 %v3358_v42 }
 0x378   :  { %v3438_v26 = vadd.s32 %v915_v5, %v913_v36  ;;  %1023 = vmin.xlane.f32.xlu1 %v3434_v11  ;;  %v3442_v3 = vsel %vm981_vm13, 1e+30, %v3106_v37  ;;  %v956_v5 = vcvt.f32.s32 %v3379_v6 }
 0x379   :  { %v828_v50 = vpop.xlane.xlu1 %827  ;;  %1021 = vmin.xlane.f32.xlu0 %v3442_v3  ;;  %v3445_v21 = vadd.s32 %v901_v35, %v899_v59  ;;  %v859_v17 = vshll.u32 %v858_v54, 16 }
 0x37a   :  { %v829_v56 = vcvt.f32.s32 %v828_v50  ;;  %v814_v51 = vpop.xlane.xlu0 %813  ;;  %vm984_vm14 = vcmp.eq.s32.totalorder %v3175_v14, %v3438_v26 }
 0x37b   :  { %v815_v52 = vcvt.f32.s32 %v814_v51  ;;  %v3452_v37 = vsel %vm984_vm14, 1e+30, %v3113_v62  ;;  %vm983_vm15 = vcmp.eq.s32.totalorder %v3175_v14, %v3445_v21  ;;  %v928_v62 = vcvt.f32.s32 %v3370_v49 }
 0x37c   :  { %v3456_v9 = vadd.s32 %v831_v55, %v829_v56  ;;  %1027 = vmin.xlane.f32.xlu1 %v3452_v37  ;;  %v3460_v42 = vsel %vm983_vm15, 1e+30, %v3118_v46  ;;  %v943_v49 = vshll.u32 %v942_v41, 16 }
 0x37d   :  { %v3463_v32 = vadd.s32 %v817_v23, %v815_v52  ;;  %v856_v15 = vpop.xlane.xlu1 %855  ;;  %1025 = vmin.xlane.f32.xlu0 %v3460_v42  ;;  %v929_v30 = vshll.u32 %v928_v62, 16 }
 0x37e   :  { %v857_v13 = vcvt.f32.s32 %v856_v15  ;;  %v842_v8 = vpop.xlane.xlu0 %841  ;;  %vm978_vm1 = vcmp.eq.s32.totalorder %v3175_v14, %v3456_v9 }
 0x37f   :  { %v843_v18 = vcvt.f32.s32 %v842_v8  ;;  %v3470_v46 = vsel %vm978_vm1, 1e+30, %v3127_v10  ;;  %vm977_vm2 = vcmp.eq.s32.totalorder %v3175_v14, %v3463_v32  ;;  %v970_v10 = vcvt.f32.s32 %v3377_v53 }
 0x380   :  { %v3474_v48 = vadd.s32 %v859_v17, %v857_v13  ;;  %1015 = vmin.xlane.f32.xlu1 %v3470_v46  ;;  %v3478_v31 = vsel %vm977_vm2, 1e+30, %v3136_v16 }
 0x381   :  { %v3480_v39 = vadd.s32 %v845_v12, %v843_v18  ;;  %v940_v28 = vpop.xlane.xlu1 %939  ;;  %1013 = vmin.xlane.f32.xlu0 %v3478_v31  ;;  %v971_v6 = vshll.u32 %v970_v10, 16 }
 0x382   :  { %v941_v47 = vcvt.f32.s32 %v940_v28  ;;  %v926_v38 = vpop.xlane.xlu0 %925  ;;  %vm980_vm3 = vcmp.eq.s32.totalorder %v3175_v14, %v3474_v48 }
 0x383   :  { %v927_v20 = vcvt.f32.s32 %v926_v38  ;;  %v3488_v16 = vsel %vm980_vm3, 1e+30, %v3147_v19  ;;  %vm979_vm4 = vcmp.eq.s32.totalorder %v3175_v14, %v3480_v39  ;;  %v957_v19 = vshll.u32 %v956_v5, 16 }
 0x384   :  { %v3492_v36 = vadd.s32 %v943_v49, %v941_v47  ;;  %1019 = vmin.xlane.f32.xlu1 %v3488_v16  ;;  %v3496_v53 = vsel %vm979_vm4, 1e+30, %v3156_v24 }
 0x385   :  { %v3498_v22 = vadd.s32 %v929_v30, %v927_v20  ;;  %v968_v35 = vpop.xlane.xlu1 %967  ;;  %1017 = vmin.xlane.f32.xlu0 %v3496_v53 }
 0x386   :  { %v969_v59 = vcvt.f32.s32 %v968_v35  ;;  %v954_v55 = vpop.xlane.xlu0 %953  ;;  %vm986_vm5 = vcmp.eq.s32.totalorder %v3175_v14, %v3492_v36 }
 0x387   :  { %v955_v50 = vcvt.f32.s32 %v954_v55  ;;  %v3504_v23 = vsel %vm986_vm5, 1e+30, %v3161_v34  ;;  %vm985_vm6 = vcmp.eq.s32.totalorder %v3175_v14, %v3498_v22 }
 0x388   :  { %v3508_v24 = vadd.s32 %v971_v6, %v969_v59  ;;  %1031 = vmin.xlane.f32.xlu1 %v3504_v23  ;;  %v3512_v54 = vsel %vm985_vm6, 1e+30, %v3166_v25 }
 0x389   :  { %v3514_v56 = vadd.s32 %v957_v19, %v955_v50  ;;  %1029 = vmin.xlane.f32.xlu0 %v3512_v54 }
 0x38a   :  { %vm988_vm7 = vcmp.eq.s32.totalorder %v3175_v14, %v3508_v24 }
 0x38b   :  { %v3520_v34 = vsel %vm988_vm7, 1e+30, %v3169_v58  ;;  %vm987_vm8 = vcmp.eq.s32.totalorder %v3175_v14, %v3514_v56 }
 0x38c   :  { %1035 = vmin.xlane.f32.xlu1 %v3520_v34  ;;  %v3526_v51 = vsel %vm987_vm8, 1e+30, %v3171_v44 }
 0x38d   :  { %1033 = vmin.xlane.f32.xlu0 %v3526_v51 }
 0x3f5   :  { %v1008_v25 = vpop.xlane.xlu1 %1007 }
 0x3f6   :  { %vm1038_vm9 = vcmp.eq.f32.partialorder %v3396_v1, %v1008_v25  ;;  %v1006_v60 = vpop.xlane.xlu0 %1005 }
 0x3f7   :  { %v3531_v52 = vsel %vm1038_vm9, %v3175_v14, 128  ;;  %vm1037_vm10 = vcmp.eq.f32.partialorder %v3402_v61, %v1006_v60 }
 0x3f8   :  { %v1084_v58 = vshra.s32 %v3531_v52, 16  ;;  %v3536_v41 = vsel %vm1037_vm10, %v3175_v14, 128 }
 0x3f9   :  { %v1070_v15 = vshra.s32 %v3536_v41, 16 }
 0x3fa   :  { %v1012_v44 = vpop.xlane.xlu1 %1011  ;;  %v1010_v17 = vpop.xlane.xlu0 %1009  ;;  %v3539_v62 = vcvt.s32.f32 %v1084_v58 }
 0x3fb   :  { %vm1040_vm11 = vcmp.eq.f32.partialorder %v3414_v4, %v1012_v44  ;;  %vm1039_vm12 = vcmp.eq.f32.partialorder %v3417_v40, %v1010_v17  ;;  %v3543_v1 = vcvt.s32.f32 %v1070_v15 }
 0x3fc   :  { %v3546_v13 = vsel %vm1040_vm11, %v3175_v14, 128  ;;  %v3549_v61 = vsel %vm1039_vm12, %v3175_v14, 128  ;;  %1087 = vmin.xlane.f32.xlu1 %v3539_v62 }
 0x3fd   :  { %v1112_v8 = vshra.s32 %v3546_v13, 16  ;;  %v1098_v12 = vshra.s32 %v3549_v61, 16  ;;  %1073 = vmin.xlane.f32.xlu0 %v3543_v1 }
 0x3ff   :  { %v3555_v18 = vcvt.s32.f32 %v1112_v8  ;;  %v3557_v4 = vcvt.s32.f32 %v1098_v12 }
 0x401   :  { %1115 = vmin.xlane.f32.xlu1 %v3555_v18  ;;  %1101 = vmin.xlane.f32.xlu0 %v3557_v4 }
 0x405   :  { %v1024_v40 = vpop.xlane.xlu1 %1023 }
 0x406   :  { %v1022_v49 = vpop.xlane.xlu0 %1021  ;;  %vm1046_vm15 = vcmp.eq.f32.partialorder %v3434_v11, %v1024_v40 }
 0x407   :  { %vm1045_vm1 = vcmp.eq.f32.partialorder %v3442_v3, %v1022_v49  ;;  %v3577_v55 = vsel %vm1046_vm15, %v3175_v14, 128 }
 0x408   :  { %v3586_v3 = vsel %vm1045_vm1, %v3175_v14, 128 }
 0x409   :  { %v1028_v28 = vpop.xlane.xlu1 %1027 }
 0x40a   :  { %v1026_v30 = vpop.xlane.xlu0 %1025  ;;  %vm1048_vm4 = vcmp.eq.f32.partialorder %v3452_v37, %v1028_v28  ;;  %v1182_v37 = vshra.s32 %v3586_v3, 16 }
 0x40b   :  { %vm1047_vm5 = vcmp.eq.f32.partialorder %v3460_v42, %v1026_v30  ;;  %v3602_v15 = vsel %vm1048_vm4, %v3175_v14, 128 }
 0x40c   :  { %v3607_v17 = vsel %vm1047_vm5, %v3175_v14, 128  ;;  %v1224_v8 = vshra.s32 %v3602_v15, 16  ;;  %v3620_v30 = vcvt.s32.f32 %v1182_v37 }
 0x40d   :  { %v1016_v10 = vpop.xlane.xlu1 %1015  ;;  %v1210_v49 = vshra.s32 %v3607_v17, 16 }
 0x40e   :  { %vm1042_vm13 = vcmp.eq.f32.partialorder %v3470_v46, %v1016_v10  ;;  %v1014_v47 = vpop.xlane.xlu0 %1013  ;;  %v3630_v10 = vcvt.s32.f32 %v1224_v8  ;;  %v1111_v8 = vand.u32 65535, %v3546_v13 }
 0x40f   :  { %v3563_v38 = vsel %vm1042_vm13, %v3175_v14, 128  ;;  %vm1041_vm14 = vcmp.eq.f32.partialorder %v3478_v31, %v1014_v47 }
 0x410   :  { %v1140_v5 = vshra.s32 %v3563_v38, 16  ;;  %v3569_v20 = vsel %vm1041_vm14, %v3175_v14, 128 }
 0x411   :  { %v1126_v35 = vshra.s32 %v3569_v20, 16  ;;  %v1020_v6 = vpop.xlane.xlu1 %1019 }
 0x412   :  { %vm1044_vm2 = vcmp.eq.f32.partialorder %v3488_v16, %v1020_v6  ;;  %v1018_v46 = vpop.xlane.xlu0 %1017  ;;  %v3574_v59 = vcvt.s32.f32 %v1140_v5 }
 0x413   :  { %v3580_v11 = vsel %vm1044_vm2, %v3175_v14, 128  ;;  %vm1043_vm3 = vcmp.eq.f32.partialorder %v3496_v53, %v1018_v46  ;;  %v3583_v31 = vcvt.s32.f32 %v1126_v35  ;;  %v1196_v53 = vshra.s32 %v3577_v55, 16 }
 0x414   :  { %v1168_v16 = vshra.s32 %v3580_v11, 16  ;;  %v3591_v19 = vsel %vm1043_vm3, %v3175_v14, 128  ;;  %1143 = vmin.xlane.f32.xlu1 %v3574_v59  ;;  %v3636_v35 = vcvt.s32.f32 %v1210_v49  ;;  %v1125_v49 = vand.u32 65535, %v3569_v20 }
 0x415   :  { %v1154_v50 = vshra.s32 %v3591_v19, 16  ;;  %v1032_v25 = vpop.xlane.xlu1 %1031  ;;  %1129 = vmin.xlane.f32.xlu0 %v3583_v31  ;;  %v3614_v40 = vcvt.s32.f32 %v1196_v53  ;;  %v1083_v53 = vand.u32 65535, %v3531_v52  ;;  %v1195_v20 = vand.u32 65535, %v3577_v55 }
 0x416   :  { %v1030_v60 = vpop.xlane.xlu0 %1029  ;;  %v3598_v58 = vcvt.s32.f32 %v1168_v16  ;;  %vm1050_vm6 = vcmp.eq.f32.partialorder %v3504_v23, %v1032_v25  ;;  %v1223_v55 = vand.u32 65535, %v3602_v15 }
 0x417   :  { %v3604_v44 = vcvt.s32.f32 %v1154_v50  ;;  %vm1049_vm7 = vcmp.eq.f32.partialorder %v3512_v54, %v1030_v60  ;;  %v3618_v28 = vsel %vm1050_vm6, %v3175_v14, 128  ;;  %v1069_v60 = vand.u32 65535, %v3536_v41 }
 0x418   :  { %1171 = vmin.xlane.f32.xlu1 %v3598_v58  ;;  %v3623_v23 = vsel %vm1049_vm7, %v3175_v14, 128  ;;  %v1252_v54 = vshra.s32 %v3618_v28, 16  ;;  %v1113_v41 = vcvt.s32.f32 %v1111_v8  ;;  %v1225_v15 = vcvt.s32.f32 %v1223_v55 }
 0x419   :  { %v1036_v42 = vpop.xlane.xlu1 %1035  ;;  %1157 = vmin.xlane.f32.xlu0 %v3604_v44  ;;  %v1238_v47 = vshra.s32 %v3623_v23, 16 }
 0x41a   :  { %v1034_v12 = vpop.xlane.xlu0 %1033  ;;  %vm1052_vm8 = vcmp.eq.f32.partialorder %v3520_v34, %v1036_v42  ;;  %v1085_v42 = vcvt.s32.f32 %v1083_v53 }
 0x41b   :  { %vm1051_vm9 = vcmp.eq.f32.partialorder %v3526_v51, %v1034_v12  ;;  %v3634_v5 = vsel %vm1052_vm8, %v3175_v14, 128  ;;  %v3644_v51 = vcvt.s32.f32 %v1252_v54  ;;  %v3647_v16 = vcvt.s32.f32 %v1238_v47 }
 0x41c   :  { %1199 = vmin.xlane.f32.xlu1 %v3614_v40  ;;  %v3639_v6 = vsel %vm1051_vm9, %v3175_v14, 128  ;;  %v1280_v34 = vshra.s32 %v3634_v5, 16  ;;  %v1097_v12 = vand.u32 65535, %v3549_v61  ;;  %v1167_v54 = vand.u32 65535, %v3580_v11 }
 0x41d   :  { %1185 = vmin.xlane.f32.xlu0 %v3620_v30  ;;  %v1266_v46 = vshra.s32 %v3639_v6, 16 }
 0x41e   :  { %v3651_v50 = vcvt.s32.f32 %v1280_v34  ;;  %v1099_v13 = vcvt.s32.f32 %v1097_v12 }
 0x41f   :  { %v3653_v25 = vcvt.s32.f32 %v1266_v46  ;;  %v1153_v46 = vand.u32 65535, %v3591_v19  ;;  %v1181_v19 = vand.u32 65535, %v3586_v3  ;;  %v1209_v3 = vand.u32 65535, %v3607_v17 }
 0x420   :  { %1227 = vmin.xlane.f32.xlu1 %v3630_v10 }
 0x421   :  { %1213 = vmin.xlane.f32.xlu0 %v3636_v35 }
 0x424   :  { %1255 = vmin.xlane.f32.xlu1 %v3644_v51 }
 0x425   :  { %1241 = vmin.xlane.f32.xlu0 %v3647_v16 }
 0x428   :  { %1283 = vmin.xlane.f32.xlu1 %v3651_v50 }
 0x429   :  { %1269 = vmin.xlane.f32.xlu0 %v3653_v25 }
 0x439   :  { %1425 = vperm.xlu1 %2432, %v3389_v2  }
 0x43d   :  { %1428 = vperm.xlu1 %2432, %v3407_v27  }
 0x43f   :  { %1422 = vperm.xlu0 %2431, %v3391_v63   ;;  %v1071_v63 = vcvt.s32.f32 %v1069_v60  ;;  %v1169_v60 = vcvt.s32.f32 %v1167_v54 }
 0x441   :  { %1431 = vperm.xlu1 %2432, %v3404_v57  }
 0x445   :  { %1434 = vperm.xlu1 %2432, %v3428_v7  }
 0x489   :  { %v3664_v37 = vpop.xlane.xlu1 %1087 }
 0x48a   :  { %vm1089_vm10 = vcmp.eq.f32.partialorder %v3539_v62, %v3664_v37  ;;  %v3670_v2 = vpop.xlane.xlu0 %1073 }
 0x48b   :  { %vm1075_vm11 = vcmp.eq.f32.partialorder %v3543_v1, %v3670_v2  ;;  %v1090_v57 = vsel %vm1089_vm10, %v1085_v42, inf  ;;  %v1139_v1 = vand.u32 65535, %v3563_v38  ;;  %v1155_v42 = vcvt.s32.f32 %v1153_v46 }
 0x48c   :  { %1091 = vmin.xlane.f32.xlu1 %v1090_v57  ;;  %v1076_v27 = vsel %vm1075_vm11, %v1071_v63, inf  ;;  %v1197_v63 = vcvt.s32.f32 %v1195_v20  ;;  %v1183_v57 = vcvt.s32.f32 %v1181_v19  ;;  %v3774_v20 = vld [vmem:[%s4377_s0 + $0x20] sm:$0xff] }
 0x48d   :  { %1077 = vmin.xlane.f32.xlu0 %v1076_v27  ;;  %v1141_v34 = vcvt.s32.f32 %v1139_v1 }
 0x48e   :  { %v3674_v7 = vpop.xlane.xlu1 %1115  ;;  %v3676_v52 = vpop.xlane.xlu0 %1101 }
 0x48f   :  { %vm1117_vm12 = vcmp.eq.f32.partialorder %v3555_v18, %v3674_v7  ;;  %vm1103_vm13 = vcmp.eq.f32.partialorder %v3557_v4, %v3676_v52  ;;  %v1127_v4 = vcvt.s32.f32 %v1125_v49 }
 0x490   :  { %v1118_v62 = vsel %vm1117_vm12, %v1113_v41, inf  ;;  %v1104_v61 = vsel %vm1103_vm13, %v1099_v13, inf  ;;  %v1237_v13 = vand.u32 65535, %v3623_v23 }
 0x491   :  { %1119 = vmin.xlane.f32.xlu1 %v1118_v62  ;;  %1105 = vmin.xlane.f32.xlu0 %v1104_v61  ;;  %v1265_v61 = vand.u32 65535, %v3639_v6  ;;  %v1251_v6 = vand.u32 65535, %v3618_v28  ;;  %v3753_v28 = vld [vmem:[%s4377_s0 + $0x8] sm:$0xff] }
 0x492   :  { %v1239_v49 = vcvt.s32.f32 %v1237_v13 }
 0x4a1   :  { %v3685_v47 = vpop.xlane.xlu1 %1143 }
 0x4a2   :  { %vm1145_vm14 = vcmp.eq.f32.partialorder %v3574_v59, %v3685_v47  ;;  %v3690_v18 = vpop.xlane.xlu0 %1129 }
 0x4a3   :  { %vm1131_vm15 = vcmp.eq.f32.partialorder %v3583_v31, %v3690_v18  ;;  %v1146_v53 = vsel %vm1145_vm14, %v1141_v34, inf }
 0x4a4   :  { %1147 = vmin.xlane.f32.xlu1 %v1146_v53  ;;  %v1132_v38 = vsel %vm1131_vm15, %v1127_v4, inf  ;;  %v1253_v4 = vcvt.s32.f32 %v1251_v6 }
 0x4a5   :  { %v3695_v11 = vpop.xlane.xlu1 %1171  ;;  %1133 = vmin.xlane.f32.xlu0 %v1132_v38 }
 0x4a6   :  { %vm1173_vm1 = vcmp.eq.f32.partialorder %v3598_v58, %v3695_v11  ;;  %v3700_v59 = vpop.xlane.xlu0 %1157 }
 0x4a7   :  { %vm1159_vm2 = vcmp.eq.f32.partialorder %v3604_v44, %v3700_v59  ;;  %v1174_v31 = vsel %vm1173_vm1, %v1169_v60, inf  ;;  %v3779_v60 = vld [vmem:[%s4377_s0 + $0x28] sm:$0xff] }
 0x4a8   :  { %1175 = vmin.xlane.f32.xlu1 %v1174_v31  ;;  %v1160_v8 = vsel %vm1159_vm2, %v1155_v42, inf  ;;  %v2404_v19 = vpack.c.bf16 %v3779_v60, %v3774_v20  ;;  %v3786_v42 = vld [vmem:[%s4377_s0 + $0x30] sm:$0xff]  ;;  %v3791_v31 = vld [vmem:[%s4377_s0 + $0x38] sm:$0xff] }
 0x4a9   :  { %v3705_v12 = vpop.xlane.xlu1 %1199  ;;  %1161 = vmin.xlane.f32.xlu0 %v1160_v8  ;;  %v2408_v8 = vpack.c.bf16 %v3791_v31, %v3786_v42 }
 0x4aa   :  { %vm1201_vm3 = vcmp.eq.f32.partialorder %v3614_v40, %v3705_v12  ;;  %v3710_v58 = vpop.xlane.xlu0 %1185  ;;  %v1211_v40 = vcvt.s32.f32 %v1209_v3  ;;  %v3805_v3 = vld [vmem:[%s4377_s0 + $0x48] sm:$0xff] }
 0x4ab   :  { %vm1187_vm4 = vcmp.eq.f32.partialorder %v3620_v30, %v3710_v58  ;;  %v1202_v44 = vsel %vm1201_vm3, %v1197_v63, inf  ;;  %v3800_v63 = vld [vmem:[%s4377_s0 + $0x40] sm:$0xff] }
 0x4ac   :  { %1203 = vmin.xlane.f32.xlu1 %v1202_v44  ;;  %v1188_v27 = vsel %vm1187_vm4, %v1183_v57, inf  ;;  %v2412_v57 = vpack.c.bf16 %v3805_v3, %v3800_v63 }
 0x4ad   :  { %v3714_v41 = vpop.xlane.xlu1 %1227  ;;  %1189 = vmin.xlane.f32.xlu0 %v1188_v27  ;;  %v3814_v27 = vld [vmem:[%s4377_s0 + $0x50] sm:$0xff] }
 0x4ae   :  { %vm1229_vm5 = vcmp.eq.f32.partialorder %v3630_v10, %v3714_v41  ;;  %v3719_v17 = vpop.xlane.xlu0 %1213  ;;  %v1267_v10 = vcvt.s32.f32 %v1265_v61 }
 0x4af   :  { %vm1215_vm6 = vcmp.eq.f32.partialorder %v3636_v35, %v3719_v17  ;;  %v1230_v62 = vsel %vm1229_vm5, %v1225_v15, inf  ;;  %v3819_v15 = vld [vmem:[%s4377_s0 + $0x58] sm:$0xff] }
 0x4b0   :  { %1231 = vmin.xlane.f32.xlu1 %v1230_v62  ;;  %v1216_v30 = vsel %vm1215_vm6, %v1211_v40, inf  ;;  %v2416_v13 = vpack.c.bf16 %v3819_v15, %v3814_v27  ;;  %v3826_v40 = vld [vmem:[%s4377_s0 + $0x60] sm:$0xff]  ;;  %v3831_v62 = vld [vmem:[%s4377_s0 + $0x68] sm:$0xff] }
 0x4b1   :  { %1217 = vmin.xlane.f32.xlu0 %v1216_v30  ;;  %v3733_v34 = vpop.xlane.xlu1 %1255  ;;  %v2420_v30 = vpack.c.bf16 %v3831_v62, %v3826_v40 }
 0x4b2   :  { %v3724_v1 = vpop.xlane.xlu0 %1241  ;;  %vm1257_vm9 = vcmp.eq.f32.partialorder %v3644_v51, %v3733_v34 }
 0x4b3   :  { %vm1243_vm7 = vcmp.eq.f32.partialorder %v3647_v16, %v3724_v1  ;;  %v1279_v16 = vand.u32 65535, %v3634_v5  ;;  %v1258_v53 = vsel %vm1257_vm9, %v1253_v4, inf }
 0x4b4   :  { %v1244_v23 = vsel %vm1243_vm7, %v1239_v49, inf  ;;  %v1094_v49 = vcvt.f32.s32 %v3664_v37  ;;  %v3845_v37 = vld [vmem:[%s4377_s0 + $0x70] sm:$0xff] }
 0x4b5   :  { %1245 = vmin.xlane.f32.xlu0 %v1244_v23  ;;  %v3739_v46 = vpop.xlane.xlu1 %1283 }
 0x4b6   :  { %v3728_v54 = vpop.xlane.xlu0 %1269  ;;  %vm1285_vm10 = vcmp.eq.f32.partialorder %v3651_v50, %v3739_v46  ;;  %v1095_v6 = vshll.u32 %v1094_v49, 16 }
 0x4b7   :  { %vm1271_vm8 = vcmp.eq.f32.partialorder %v3653_v25, %v3728_v54  ;;  %v1281_v25 = vcvt.s32.f32 %v1279_v16 }
 0x4b8   :  { %v1272_v35 = vsel %vm1271_vm8, %v1267_v10, inf  ;;  %v1080_v10 = vcvt.f32.s32 %v3670_v2  ;;  %v3850_v2 = vld [vmem:[%s4377_s0 + $0x78] sm:$0xff] }
 0x4b9   :  { %1273 = vmin.xlane.f32.xlu0 %v1272_v35  ;;  %v1286_v38 = vsel %vm1285_vm10, %v1281_v25, inf  ;;  %v3757_v51 = vpop.permute.xlu1 %1425  ;;  %v1122_v25 = vcvt.f32.s32 %v3674_v7 }
 0x4ba   :  { %vm1470_vm14 = vcmp.eq.s32.totalorder %v3175_v14, %v3757_v51 }
 0x4bb   :  { %v1123_v7 = vshll.u32 %v1122_v25, 16 }
 0x4bd   :  { %v3795_v55 = vpop.permute.xlu1 %1428 }
 0x4be   :  { %v3838_v23 = vpop.permute.xlu0 %1422  ;;  %vm1471_vm3 = vcmp.eq.s32.totalorder %v3175_v14, %v3795_v55 }
 0x4bf   :  { %vm1469_vm12 = vcmp.eq.s32.totalorder %v3175_v14, %v3838_v23 }
 0x4c1   :  { %1437 = vperm.xlu1 %2432, %v3425_v43   ;;  %v3748_v43 = vld [vmem:[%s4377_s0] sm:$0xff]  ;;  %v3809_v44 = vpop.permute.xlu1 %1431 }
 0x4c2   :  { %v2396_v5 = vpack.c.bf16 %v3753_v28, %v3748_v43  ;;  %vm1472_vm5 = vcmp.eq.s32.totalorder %v3175_v14, %v3809_v44  ;;  %v4399_v44 = vld [vmem:[#allocation7_spill] sm:$0xff] }
 0x4c4   :  { %2397 = vmatprep.subr.bf16.mxu1 %v2396_v5 }
 0x4c5   :  { %2399 = vmatpush3.bf16.msra.mxu1 %v2396_v5  ;;  %v3835_v61 = vpop.permute.xlu1 %1434 }
 0x4c6   :  { %vm1473_vm9 = vcmp.eq.s32.totalorder %v3175_v14, %v3835_v61 }
 0x4e5   :  { %1259 = vmin.xlane.f32.xlu1 %v1258_v53  ;;  %v1081_v53 = vshll.u32 %v1080_v10, 16 }
 0x4e9   :  { %1287 = vmin.xlane.f32.xlu1 %v1286_v38 }
 0x4fa   :  { %1440 = vperm.xlu1 %2432, %v3445_v21   ;;  %v3767_v21 = vld [vmem:[%s4377_s0 + $0x18] sm:$0xff] }
 0x4fe   :  { %1443 = vperm.xlu1 %2432, %v3438_v26   ;;  %v3762_v26 = vld [vmem:[%s4377_s0 + $0x10] sm:$0xff] }
 0x4ff   :  { %v2400_v50 = vpack.c.bf16 %v3767_v21, %v3762_v26 }
 0x501   :  { %2401 = vmatprep.subr.bf16.mxu1 %v2400_v50 }
 0x502   :  { %2403 = vmatpush3.bf16.msra.mxu1 %v2400_v50  ;;  %v2424_v50 = vpack.c.bf16 %v3850_v2, %v3845_v37 }
 0x503   :  { %2405 = vmatprep.subr.bf16.mxu1 %v2404_v19 }
 0x506   :  { %2407 = vmatpush3.bf16.msra.mxu1 %v2404_v19 }
 0x507   :  { %2409 = vmatprep.subr.bf16.mxu1 %v2408_v8 }
 0x50a   :  { %2411 = vmatpush3.bf16.msra.mxu1 %v2408_v8 }
 0x50b   :  { %2413 = vmatprep.subr.bf16.mxu1 %v2412_v57 }
 0x50e   :  { %2415 = vmatpush3.bf16.msra.mxu1 %v2412_v57 }
 0x50f   :  { %2417 = vmatprep.subr.bf16.mxu1 %v2416_v13 }
 0x512   :  { %2419 = vmatpush3.bf16.msra.mxu1 %v2416_v13  ;;  %v1108_v13 = vcvt.f32.s32 %v3676_v52 }
 0x513   :  { %2421 = vmatprep.subr.bf16.mxu1 %v2420_v30 }
 0x516   :  { %2423 = vmatpush3.bf16.msra.mxu1 %v2420_v30 }
 0x517   :  { %2425 = vmatprep.subr.bf16.mxu1 %v2424_v50 }
 0x519   :  { %v1092_v35 = vpop.xlane.xlu1 %1091 }
 0x51a   :  { %v1093_v16 = vcvt.f32.s32 %v1092_v35  ;;  %v1078_v4 = vpop.xlane.xlu0 %1077  ;;  %2427 = vmatpush3.bf16.msra.mxu1 %v2424_v50  ;;  %v1109_v35 = vshll.u32 %v1108_v13, 16 }
 0x51b   :  { %v1079_v38 = vcvt.f32.s32 %v1078_v4 }
 0x51c   :  { %v1096_v5 = vadd.s32 %v1095_v6, %v1093_v16  ;;  %v1150_v16 = vcvt.f32.s32 %v3685_v47 }
 0x51d   :  { %v1082_v19 = vadd.s32 %v1081_v53, %v1079_v38  ;;  %v1136_v53 = vcvt.f32.s32 %v3690_v18  ;;  %v1206_v18 = vcvt.f32.s32 %v3705_v12 }
 0x51e   :  { %v1120_v8 = vpop.xlane.xlu1 %1119  ;;  %1489 = vperm.xlu0 %2431, %v1096_v5   ;;  %v1106_v57 = vpop.xlane.xlu0 %1105  ;;  %v1151_v4 = vshll.u32 %v1150_v16, 16 }
 0x51f   :  { %v1121_v30 = vcvt.f32.s32 %v1120_v8  ;;  %1486 = vperm.xlu1 %2432, %v1082_v19   ;;  %v1107_v10 = vcvt.f32.s32 %v1106_v57  ;;  %v1137_v19 = vshll.u32 %v1136_v53, 16 }
 0x521   :  { %v1124_v49 = vadd.s32 %v1123_v7, %v1121_v30  ;;  %v1110_v6 = vadd.s32 %v1109_v35, %v1107_v10  ;;  %v1207_v30 = vshll.u32 %v1206_v18, 16 }
 0x523   :  { %1495 = vperm.xlu0 %2431, %v1124_v49   ;;  %1446 = vperm.xlu1 %2432, %v3463_v32   ;;  %v1192_v49 = vcvt.f32.s32 %v3710_v58  ;;  %v1178_v58 = vcvt.f32.s32 %v3695_v11 }
 0x525   :  { %v1193_v35 = vshll.u32 %v1192_v49, 16 }
 0x527   :  { %1449 = vperm.xlu1 %2432, %v3456_v9   ;;  %1492 = vperm.xlu0 %2431, %v1110_v6   ;;  %v1164_v9 = vcvt.f32.s32 %v3700_v59  ;;  %v1234_v6 = vcvt.f32.s32 %v3714_v41 }
 0x529   :  { %v1165_v57 = vshll.u32 %v1164_v9, 16  ;;  %v1262_v9 = vcvt.f32.s32 %v3733_v34 }
 0x52b   :  { %1452 = vperm.xlu1 %2432, %v3480_v39  }
 0x52f   :  { %1455 = vperm.xlu1 %2432, %v3474_v48  }
 0x531   :  { %v1148_v52 = vpop.xlane.xlu1 %1147 }
 0x532   :  { %v1149_v25 = vcvt.f32.s32 %v1148_v52  ;;  %v1134_v38 = vpop.xlane.xlu0 %1133 }
 0x533   :  { %1458 = vperm.xlu1 %2432, %v3498_v22   ;;  %v1135_v32 = vcvt.f32.s32 %v1134_v38 }
 0x534   :  { %v1152_v5 = vadd.s32 %v1151_v4, %v1149_v25  ;;  %v1220_v4 = vcvt.f32.s32 %v3719_v17 }
 0x535   :  { %v1176_v50 = vpop.xlane.xlu1 %1175  ;;  %v1138_v47 = vadd.s32 %v1137_v19, %v1135_v32  ;;  %v1179_v32 = vshll.u32 %v1178_v58, 16 }
 0x536   :  { %1513 = vperm.xlu0 %2431, %v1152_v5   ;;  %v1162_v39 = vpop.xlane.xlu0 %1161  ;;  %v1221_v38 = vshll.u32 %v1220_v4, 16 }
 0x537   :  { %1461 = vperm.xlu1 %2432, %v3492_v36   ;;  %v1163_v48 = vcvt.f32.s32 %v1162_v39 }
 0x539   :  { %v1204_v8 = vpop.xlane.xlu1 %1203  ;;  %v1166_v22 = vadd.s32 %v1165_v57, %v1163_v48  ;;  %v1248_v48 = vcvt.f32.s32 %v3724_v1 }
 0x53a   :  { %1510 = vperm.xlu0 %2431, %v1138_v47   ;;  %v1205_v7 = vcvt.f32.s32 %v1204_v8  ;;  %v1190_v13 = vpop.xlane.xlu0 %1189  ;;  %v1263_v47 = vshll.u32 %v1262_v9, 16 }
 0x53b   :  { %1464 = vperm.xlu1 %2432, %v3514_v56   ;;  %v1191_v36 = vcvt.f32.s32 %v1190_v13  ;;  %v1235_v56 = vshll.u32 %v1234_v6, 16  ;;  %v1249_v18 = vshll.u32 %v1248_v48, 16 }
 0x53c   :  { %v1208_v59 = vadd.s32 %v1207_v30, %v1205_v7  ;;  %v1290_v30 = vcvt.f32.s32 %v3739_v46  ;;  %v2514_v46 = vmov 0.5  }
 0x53d   :  { %v1232_v10 = vpop.xlane.xlu1 %1231  ;;  %v1194_v12 = vadd.s32 %v1193_v35, %v1191_v36 }
 0x53e   :  { %1516 = vperm.xlu0 %2431, %v1166_v22   ;;  %v1233_v16 = vcvt.f32.s32 %v1232_v10  ;;  %v1218_v52 = vpop.xlane.xlu0 %1217  ;;  %v1276_v22 = vcvt.f32.s32 %v3728_v54  ;;  %v1291_v36 = vshll.u32 %v1290_v30, 16 }
 0x53f   :  { %1467 = vperm.xlu1 %2432, %v3508_v24   ;;  %v1219_v25 = vcvt.f32.s32 %v1218_v52  ;;  %v1177_v24 = vcvt.f32.s32 %v1176_v50  ;;  %v4398_v52 = vld [vmem:[#allocation4_spill] sm:$0xff] }
 0x540   :  { %v1236_v53 = vadd.s32 %v1235_v56, %v1233_v16  ;;  %v1277_v49 = vshll.u32 %v1276_v22, 16  ;;  %v4397_v16 = vld [vmem:[#allocation5_spill] sm:$0xff] }
 0x541   :  { %v1222_v5 = vadd.s32 %v1221_v38, %v1219_v25  ;;  %v1180_v19 = vadd.s32 %v1179_v32, %v1177_v24  ;;  %v3872_v41 = vpop.permute.xlu1 %1437 }
 0x542   :  { %1501 = vperm.xlu0 %2431, %v1208_v59   ;;  %v1246_v17 = vpop.xlane.xlu0 %1245 }
 0x543   :  { %v1247_v8 = vcvt.f32.s32 %v1246_v17 }
 0x545   :  { %v1250_v7 = vadd.s32 %v1249_v18, %v1247_v8 }
 0x546   :  { %1498 = vperm.xlu0 %2431, %v1194_v12   ;;  %v1274_v50 = vpop.xlane.xlu0 %1273 }
 0x547   :  { %v1275_v13 = vcvt.f32.s32 %v1274_v50 }
 0x549   :  { %v1278_v34 = vadd.s32 %v1277_v49, %v1275_v13 }
 0x54a   :  { %1507 = vperm.xlu0 %2431, %v1236_v53  }
 0x54e   :  { %1504 = vperm.xlu0 %2431, %v1222_v5  }
 0x552   :  { %1519 = vperm.xlu0 %2431, %v1180_v19  }
 0x563   :  { %635 = vmax.xlane.f32.xlu1 %v3064_v33 }
 0x572   :  { %v1260_v39 = vpop.xlane.xlu1 %1259 }
 0x573   :  { %v1261_v11 = vcvt.f32.s32 %v1260_v39 }
 0x575   :  { %v1264_v57 = vadd.s32 %v1263_v47, %v1261_v11 }
 0x576   :  { %v1288_v33 = vpop.xlane.xlu1 %1287 }
 0x577   :  { %1525 = vperm.xlu0 %2431, %v1264_v57   ;;  %v1289_v59 = vcvt.f32.s32 %v1288_v33 }
 0x579   :  { %v1292_v1 = vadd.s32 %v1291_v36, %v1289_v59  ;;  %v4400_v59 = vld [vmem:[#allocation6_spill] sm:$0xff]  ;;  %v4401_v36 = vld [vmem:[#allocation9_spill] sm:$0xff] }
 0x57a   :  { %v1441_v10 = vpop.permute.xlu1 %1440 }
 0x57b   :  { %1522 = vperm.xlu0 %2431, %v1250_v7  }
 0x57e   :  { %v1444_v35 = vpop.permute.xlu1 %1443 }
 0x57f   :  { %1528 = vperm.xlu0 %2431, %v1278_v34  }
 0x583   :  { %1531 = vperm.xlu0 %2431, %v1292_v1  }
 0x59d   :  { %v1490_v6 = vpop.permute.xlu0 %1489 }
 0x59e   :  { %vm1534_vm11 = vcmp.eq.s32.totalorder %v3175_v14, %v1490_v6  ;;  %v1487_v54 = vpop.permute.xlu1 %1486  ;;  %v4405_v6 = vld [vmem:[#allocation13_spill] sm:$0xff] }
 0x59f   :  { %vm1533_vm13 = vcmp.eq.s32.totalorder %v3175_v14, %v1487_v54  ;;  %vm1550_vm1 = vmor %vm1470_vm14, %vm1534_vm11  ;;  %vm1474_vm11 = vcmp.eq.s32.totalorder %v3175_v14, %v3872_v41 }
 0x5a0   :  { %vm1549_vm15 = vmor %vm1469_vm12, %vm1533_vm13 }
 0x5a1   :  { %2324 = vmatprep.mubr.msk.f32.mxu1 %vm1549_vm15, %v2514_v46  ;;  %vm1475_vm15 = vcmp.eq.s32.totalorder %v3175_v14, %v1441_v10  ;;  %v4402_v10 = vld [vmem:[#allocation8_spill] sm:$0xff] }
 0x5a2   :  { %637 = vmax.xlane.f32.xlu0 %v3059_v0  ;;  %2325 = vmatmul.mubr.msk.f32.vlgmr.msra.gmra.mrb[0].mxu1 %vm1550_vm1, %v2514_v46  ;;  %v1496_v12 = vpop.permute.xlu0 %1495  ;;  %v4395_v0 = vld [vmem:[#allocation3_spill] sm:$0xff]  ;;  %v1447_v53 = vpop.permute.xlu1 %1446 }
 0x5a3   :  { %vm1536_vm2 = vcmp.eq.s32.totalorder %v3175_v14, %v1496_v12 }
 0x5a4   :  { %vm1552_vm7 = vmor %vm1472_vm5, %vm1536_vm2  ;;  %vm1477_vm5 = vcmp.eq.s32.totalorder %v3175_v14, %v1447_v53 }
 0x5a6   :  { %639 = vmax.xlane.f32.xlu0 %v3076_v45  ;;  %v1493_v23 = vpop.permute.xlu0 %1492  ;;  %v4396_v45 = vld [vmem:[#allocation2_spill] sm:$0xff]  ;;  %v1450_v25 = vpop.permute.xlu1 %1449 }
 0x5a7   :  { %vm1535_vm4 = vcmp.eq.s32.totalorder %v3175_v14, %v1493_v23 }
 0x5a8   :  { %vm1551_vm6 = vmor %vm1471_vm3, %vm1535_vm4  ;;  %vm1476_vm3 = vcmp.eq.s32.totalorder %v3175_v14, %v1444_v35  ;;  %v4403_v35 = vld [vmem:[#allocation11_spill] sm:$0xff] }
 0x5a9   :  { %2327 = vmatprep.mubr.msk.f32.mxu1 %vm1551_vm6, %v2514_v46 }
 0x5aa   :  { %641 = vmax.xlane.f32.xlu0 %v3071_v29  ;;  %2328 = vmatmul.mubr.msk.f32.gmra.mrb[2].mxu1 %vm1552_vm7, %v2514_v46  ;;  %v1453_v24 = vpop.permute.xlu1 %1452 }
 0x5ae   :  { %643 = vmax.xlane.f32.xlu0 %v4395_v0  ;;  %v1456_v5 = vpop.permute.xlu1 %1455 }
 0x5b2   :  { %645 = vmax.xlane.f32.xlu0 %v4396_v45  ;;  %v1459_v32 = vpop.permute.xlu1 %1458 }
 0x5b5   :  { %v1514_v51 = vpop.permute.xlu0 %1513 }
 0x5b6   :  { %647 = vmax.xlane.f32.xlu0 %v4397_v16  ;;  %vm1542_vm7 = vcmp.eq.s32.totalorder %v3175_v14, %v1514_v51  ;;  %v1462_v19 = vpop.permute.xlu1 %1461 }
 0x5b9   :  { %v1511_v55 = vpop.permute.xlu0 %1510 }
 0x5ba   :  { %649 = vmax.xlane.f32.xlu0 %v4398_v52  ;;  %vm1541_vm1 = vcmp.eq.s32.totalorder %v3175_v14, %v1511_v55  ;;  %v1465_v9 = vpop.permute.xlu1 %1464 }
 0x5bd   :  { %v1517_v56 = vpop.permute.xlu0 %1516 }
 0x5be   :  { %651 = vmax.xlane.f32.xlu0 %v4399_v44  ;;  %v1468_v47 = vpop.permute.xlu1 %1467 }
 0x5c1   :  { %v1502_v4 = vpop.permute.xlu0 %1501 }
 0x5c2   :  { %vm1538_vm8 = vcmp.eq.s32.totalorder %v3175_v14, %v1502_v4 }
 0x5c3   :  { %vm1554_vm13 = vmor %vm1474_vm11, %vm1538_vm8  ;;  %vm1479_vm11 = vcmp.eq.s32.totalorder %v3175_v14, %v1453_v24 }
 0x5c4   :  { %vm1557_vm8 = vmor %vm1477_vm5, %vm1541_vm1  ;;  %vm1482_vm5 = vcmp.eq.s32.totalorder %v3175_v14, %v1462_v19 }
 0x5c5   :  { %v1499_v29 = vpop.permute.xlu0 %1498 }
 0x5c6   :  { %vm1537_vm10 = vcmp.eq.s32.totalorder %v3175_v14, %v1499_v29 }
 0x5c7   :  { %vm1553_vm12 = vmor %vm1473_vm9, %vm1537_vm10  ;;  %vm1543_vm9 = vcmp.eq.s32.totalorder %v3175_v14, %v1517_v56  ;;  %vm1478_vm10 = vcmp.eq.s32.totalorder %v3175_v14, %v1450_v25 }
 0x5c8   :  { %2330 = vmatprep.mubr.msk.f32.mxu1 %vm1553_vm12, %v2514_v46  ;;  %vm1558_vm12 = vmor %vm1478_vm10, %vm1542_vm7 }
 0x5c9   :  { %2331 = vmatmul.mubr.msk.f32.gmra.mrb[4].mxu1 %vm1554_vm13, %v2514_v46  ;;  %v1508_v58 = vpop.permute.xlu0 %1507  ;;  %vm1559_vm13 = vmor %vm1479_vm11, %vm1543_vm9  ;;  %vm1484_vm11 = vcmp.eq.s32.totalorder %v3175_v14, %v1468_v47 }
 0x5ca   :  { %vm1540_vm14 = vcmp.eq.s32.totalorder %v3175_v14, %v1508_v58 }
 0x5cb   :  { %vm1556_vm6 = vmor %vm1476_vm3, %vm1540_vm14  ;;  %vm1481_vm3 = vcmp.eq.s32.totalorder %v3175_v14, %v1459_v32 }
 0x5cd   :  { %v1505_v38 = vpop.permute.xlu0 %1504 }
 0x5ce   :  { %vm1539_vm2 = vcmp.eq.s32.totalorder %v3175_v14, %v1505_v38 }
 0x5cf   :  { %vm1555_vm4 = vmor %vm1475_vm15, %vm1539_vm2  ;;  %vm1480_vm15 = vcmp.eq.s32.totalorder %v3175_v14, %v1456_v5 }
 0x5d0   :  { %2333 = vmatprep.mubr.msk.f32.mxu1 %vm1555_vm4, %v2514_v46 }
 0x5d1   :  { %2334 = vmatmul.mubr.msk.f32.gmra.mrb[6].mxu1 %vm1556_vm6, %v2514_v46  ;;  %v1520_v61 = vpop.permute.xlu0 %1519 }
 0x5d2   :  { %2336 = vmatprep.mubr.msk.f32.mxu1 %vm1557_vm8, %v2514_v46  ;;  %vm1544_vm14 = vcmp.eq.s32.totalorder %v3175_v14, %v1520_v61  ;;  %vm1483_vm8 = vcmp.eq.s32.totalorder %v3175_v14, %v1465_v9 }
 0x5d3   :  { %vm1560_vm1 = vmor %vm1480_vm15, %vm1544_vm14 }
 0x5d5   :  { %2337 = vmatmul.mubr.msk.f32.gmra.mrb[8].mxu1 %vm1558_vm12, %v2514_v46 }
 0x5d6   :  { %2339 = vmatprep.mubr.msk.f32.mxu1 %vm1559_vm13, %v2514_v46 }
 0x5d9   :  { %2340 = vmatmul.mubr.msk.f32.gmra.mrb[10].mxu1 %vm1560_vm1, %v2514_v46 }
 0x5f6   :  { %v1526_v41 = vpop.permute.xlu0 %1525 }
 0x5f7   :  { %vm1546_vm2 = vcmp.eq.s32.totalorder %v3175_v14, %v1526_v41 }
 0x5f8   :  { %vm1562_vm7 = vmor %vm1482_vm5, %vm1546_vm2 }
 0x5fa   :  { %v1523_v17 = vpop.permute.xlu0 %1522 }
 0x5fb   :  { %vm1545_vm4 = vcmp.eq.s32.totalorder %v3175_v14, %v1523_v17 }
 0x5fc   :  { %vm1561_vm6 = vmor %vm1481_vm3, %vm1545_vm4 }
 0x5fd   :  { %2342 = vmatprep.mubr.msk.f32.mxu1 %vm1561_vm6, %v2514_v46 }
 0x5fe   :  { %2343 = vmatmul.mubr.msk.f32.gmra.mrb[12].mxu1 %vm1562_vm7, %v2514_v46  ;;  %v1529_v39 = vpop.permute.xlu0 %1528 }
 0x5ff   :  { %vm1547_vm9 = vcmp.eq.s32.totalorder %v3175_v14, %v1529_v39 }
 0x600   :  { %vm1563_vm10 = vmor %vm1483_vm8, %vm1547_vm9 }
 0x601   :  { %2345 = vmatprep.mubr.msk.f32.mxu1 %vm1563_vm10, %v2514_v46 }
 0x602   :  { %v1532_v48 = vpop.permute.xlu0 %1531 }
 0x603   :  { %vm1548_vm12 = vcmp.eq.s32.totalorder %v3175_v14, %v1532_v48 }
 0x604   :  { %vm1564_vm13 = vmor %vm1484_vm11, %vm1548_vm12 }
 0x605   :  { %2346 = vmatmul.mubr.msk.f32.gmra.mrb[14].mxu1 %vm1564_vm13, %v2514_v46 }
 0x675   :  { %v2326_v11 = vpop.f32.mrb[0].mxu1 }
 0x676   :  { %v1727_v8 = vsub.f32 %v3753_v28, %v2326_v11  ;;  %v1647_v57 = vpop.f32.mrb[1].mxu1 }
 0x677   :  { %v1726_v50 = vsub.f32 %v3748_v43, %v1647_v57 }
 0x678   :  { %v1743_v18 = vmul.f32 %v1727_v8, %v1727_v8 }
 0x679   :  { %v1742_v22 = vmul.f32 %v1726_v50, %v1726_v50 }
 0x67a   :  { %v1761_v7 = vsel %vm82_vm0, %v1743_v18, 0.0 }
 0x67b   :  { %1762 = vadd.xlane.f32.xlu1 %v1761_v7  ;;  %v1758_v13 = vsel %vm82_vm0, %v1742_v22, 0.0 }
 0x67c   :  { %1759 = vadd.xlane.f32.xlu0 %v1758_v13 }
 0x67d   :  { %v2329_v33 = vpop.f32.mrb[2].mxu1 }
 0x67e   :  { %v1729_v14 = vsub.f32 %v3767_v21, %v2329_v33  ;;  %v1657_v30 = vpop.f32.mrb[3].mxu1  ;;  %v4404_v21 = vld [vmem:[#allocation10_spill] sm:$0xff] }
 0x67f   :  { %v1728_v49 = vsub.f32 %v3762_v26, %v1657_v30  ;;  %v4406_v26 = vld [vmem:[#allocation12_spill] sm:$0xff] }
 0x680   :  { %v1745_v34 = vmul.f32 %v1729_v14, %v1729_v14  ;;  %653 = vmax.xlane.f32.xlu0 %v4400_v59  ;;  %v638_v14 = vpop.xlane.xlu0 %637 }
 0x681   :  { %v1744_v28 = vmul.f32 %v1728_v49, %v1728_v49 }
 0x682   :  { %v1767_v43 = vsel %vm82_vm0, %v1745_v34, 0.0 }
 0x683   :  { %1768 = vadd.xlane.f32.xlu1 %v1767_v43  ;;  %v1764_v1 = vsel %vm82_vm0, %v1744_v28, 0.0 }
 0x684   :  { %655 = vmax.xlane.f32.xlu0 %v4401_v36  ;;  %v640_v30 = vpop.xlane.xlu0 %639 }
 0x687   :  { %1765 = vadd.xlane.f32.xlu1 %v1764_v1  ;;  %v1294_v1 = vmax.f32 %v638_v14, 1e-12 }
 0x688   :  { %657 = vmax.xlane.f32.xlu0 %v4402_v10  ;;  %v642_v49 = vpop.xlane.xlu0 %641 }
 0x689   :  { %vm1318_vm15 = vcmp.eq.f32.partialorder %v1294_v1, inf  ;;  %vm1320_vm1 = vcmp.eq.f32.partialorder %v1294_v1, 0.0 }
 0x68c   :  { %659 = vmax.xlane.f32.xlu0 %v4403_v35  ;;  %v644_v34 = vpop.xlane.xlu0 %643  ;;  %v3979_v35 = vmax.f32 %v640_v30, 1e-12 }
 0x68e   :  { %vm1325_vm2 = vcmp.eq.f32.partialorder %v3979_v35, inf  ;;  %vm1327_vm3 = vcmp.eq.f32.partialorder %v3979_v35, 0.0 }
 0x690   :  { %661 = vmax.xlane.f32.xlu0 %v4404_v21  ;;  %v646_v59 = vpop.xlane.xlu0 %645 }
 0x694   :  { %663 = vmax.xlane.f32.xlu0 %v4405_v6  ;;  %v648_v28 = vpop.xlane.xlu0 %647 }
 0x698   :  { %665 = vmax.xlane.f32.xlu0 %v4406_v26  ;;  %v650_v43 = vpop.xlane.xlu0 %649 }
 0x69c   :  { %v2332_v54 = vpop.f32.mrb[4].mxu1  ;;  %v652_v36 = vpop.xlane.xlu0 %651 }
 0x69d   :  { %v1731_v46 = vsub.f32 %v3779_v60, %v2332_v54  ;;  %v1667_v12 = vpop.f32.mrb[5].mxu1  ;;  %v3986_v54 = vmax.f32 %v642_v49, 1e-12 }
 0x69e   :  { %v1730_v23 = vsub.f32 %v3774_v20, %v1667_v12  ;;  %v3989_v12 = vmax.f32 %v644_v34, 1e-12 }
 0x69f   :  { %v1747_v0 = vmul.f32 %v1731_v46, %v1731_v46  ;;  %vm1332_vm4 = vcmp.eq.f32.partialorder %v3986_v54, inf  ;;  %vm1334_vm5 = vcmp.eq.f32.partialorder %v3986_v54, 0.0 }
 0x6a0   :  { %v1746_v45 = vmul.f32 %v1730_v23, %v1730_v23  ;;  %v3993_v23 = vmax.f32 %v646_v59, 1e-12  ;;  %vm1339_vm6 = vcmp.eq.f32.partialorder %v3989_v12, inf  ;;  %vm1341_vm10 = vcmp.eq.f32.partialorder %v3989_v12, 0.0 }
 0x6a1   :  { %v1773_v51 = vsel %vm82_vm0, %v1747_v0, 0.0  ;;  %v3995_v0 = vmax.f32 %v648_v28, 1e-12 }
 0x6a2   :  { %1774 = vadd.xlane.f32.xlu1 %v1773_v51  ;;  %v1770_v56 = vsel %vm82_vm0, %v1746_v45, 0.0  ;;  %vm1346_vm8 = vcmp.eq.f32.partialorder %v3993_v23, inf  ;;  %vm1348_vm13 = vcmp.eq.f32.partialorder %v3993_v23, 0.0 }
 0x6a3   :  { %vm1353_vm11 = vcmp.eq.f32.partialorder %v3995_v0, inf }
 0x6a4   :  { %v2335_v16 = vpop.f32.mrb[6].mxu1 }
 0x6a5   :  { %v1733_v55 = vsub.f32 %v3791_v31, %v2335_v16  ;;  %v1677_v52 = vpop.f32.mrb[7].mxu1  ;;  %v3997_v16 = vmax.f32 %v650_v43, 1e-12 }
 0x6a6   :  { %v1732_v44 = vsub.f32 %v3786_v42, %v1677_v52  ;;  %1771 = vadd.xlane.f32.xlu1 %v1770_v56 }
 0x6a7   :  { %v1749_v4 = vmul.f32 %v1733_v55, %v1733_v55  ;;  %v4000_v55 = vmax.f32 %v652_v36, 1e-12 }
 0x6a8   :  { %v2338_v53 = vpop.f32.mrb[8].mxu1  ;;  %v1748_v60 = vmul.f32 %v1732_v44, %v1732_v44 }
 0x6a9   :  { %v1735_v29 = vsub.f32 %v3805_v3, %v2338_v53  ;;  %v1687_v20 = vpop.f32.mrb[9].mxu1  ;;  %v1779_v25 = vsel %vm82_vm0, %v1749_v4, 0.0 }
 0x6aa   :  { %1780 = vadd.xlane.f32.xlu1 %v1779_v25  ;;  %v1734_v24 = vsub.f32 %v3800_v63, %v1687_v20  ;;  %v1776_v61 = vsel %vm82_vm0, %v1748_v60, 0.0 }
 0x6ab   :  { %v1751_v38 = vmul.f32 %v1735_v29, %v1735_v29 }
 0x6ac   :  { %v2341_v58 = vpop.f32.mrb[10].mxu1  ;;  %v1750_v5 = vmul.f32 %v1734_v24, %v1734_v24 }
 0x6ad   :  { %v1697_v31 = vpop.f32.mrb[11].mxu1  ;;  %v1737_v42 = vsub.f32 %v3819_v15, %v2341_v58  ;;  %v1785_v32 = vsel %vm82_vm0, %v1751_v38, 0.0 }
 0x6ae   :  { %1777 = vadd.xlane.f32.xlu1 %v1776_v61  ;;  %v1736_v3 = vsub.f32 %v3814_v27, %v1697_v31  ;;  %v1782_v41 = vsel %vm82_vm0, %v1750_v5, 0.0  ;;  %v1321_v31 = vand.u32 2147483648, %v1294_v1 }
 0x6af   :  { %v1753_v19 = vmul.f32 %v1737_v42, %v1737_v42 }
 0x6b0   :  { %v1752_v9 = vmul.f32 %v1736_v3, %v1736_v3  ;;  %v1328_v3 = vand.u32 2147483648, %v3979_v35 }
 0x6b1   :  { %v1791_v17 = vsel %vm82_vm0, %v1753_v19, 0.0 }
 0x6b2   :  { %1786 = vadd.xlane.f32.xlu1 %v1785_v32  ;;  %v1788_v63 = vsel %vm82_vm0, %v1752_v9, 0.0 }
 0x6b6   :  { %1783 = vadd.xlane.f32.xlu1 %v1782_v41 }
 0x6ba   :  { %1792 = vadd.xlane.f32.xlu1 %v1791_v17 }
 0x6be   :  { %1789 = vadd.xlane.f32.xlu1 %v1788_v63 }
 0x6d1   :  { %v2344_v39 = vpop.f32.mrb[12].mxu1 }
 0x6d2   :  { %v1739_v47 = vsub.f32 %v3831_v62, %v2344_v39  ;;  %v1707_v15 = vpop.f32.mrb[13].mxu1  ;;  %v1335_v39 = vand.u32 2147483648, %v3986_v54 }
 0x6d3   :  { %v1738_v48 = vsub.f32 %v3826_v40, %v1707_v15 }
 0x6d4   :  { %v1755_v11 = vmul.f32 %v1739_v47, %v1739_v47 }
 0x6d5   :  { %v1754_v8 = vmul.f32 %v1738_v48, %v1738_v48  ;;  %v1342_v48 = vand.u32 2147483648, %v3989_v12 }
 0x6d6   :  { %v1797_v27 = vsel %vm82_vm0, %v1755_v11, 0.0 }
 0x6d7   :  { %1798 = vadd.xlane.f32.xlu1 %v1797_v27  ;;  %v1794_v7 = vsel %vm82_vm0, %v1754_v8, 0.0 }
 0x6d8   :  { %v2347_v57 = vpop.f32.mrb[14].mxu1 }
 0x6d9   :  { %v1717_v50 = vpop.f32.mrb[15].mxu1  ;;  %v1741_v18 = vsub.f32 %v3850_v2, %v2347_v57  ;;  %v636_v2 = vpop.xlane.xlu1 %635 }
 0x6da   :  { %v1740_v22 = vsub.f32 %v3845_v37, %v1717_v50  ;;  %v1293_v37 = vmax.f32 %v636_v2, 1e-12 }
 0x6db   :  { %1795 = vadd.xlane.f32.xlu1 %v1794_v7  ;;  %v1757_v33 = vmul.f32 %v1741_v18, %v1741_v18 }
 0x6dc   :  { %v1756_v13 = vmul.f32 %v1740_v22, %v1740_v22  ;;  %2433 = vrsqrt.f32 %v1293_v37  ;;  %v1314_v4 = vand.u32 2147483648, %v1293_v37  ;;  %vm1313_vm14 = vcmp.eq.f32.partialorder %v1293_v37, 0.0 }
 0x6dd   :  { %v1803_v40 = vsel %vm82_vm0, %v1757_v33, 0.0  ;;  %2435 = vrsqrt.f32 %v1294_v1  ;;  %v1349_v22 = vand.u32 2147483648, %v3993_v23 }
 0x6de   :  { %v1800_v62 = vsel %vm82_vm0, %v1756_v13, 0.0  ;;  %2437 = vrsqrt.f32 %v3979_v35  ;;  %vm1311_vm0 = vcmp.eq.f32.partialorder %v1293_v37, inf }
 0x6df   :  { %1801 = vadd.xlane.f32.xlu1 %v1800_v62 }
 0x6e3   :  { %1804 = vadd.xlane.f32.xlu1 %v1803_v40 }
 0x6e6   :  { %v2434_v46 = vpop.eup %2433 }
 0x6e7   :  { %v1310_v51 = vmul.f32 %v2434_v46, %v1293_v37  ;;  %v2436_v52 = vpop.eup %2435 }
 0x6e8   :  { %v2438_v56 = vpop.eup %2437  ;;  %v1317_v53 = vmul.f32 %v2436_v52, %v1294_v1 }
 0x6e9   :  { %v1312_v44 = vsel %vm1311_vm0, %v1293_v37, %v1310_v51  ;;  %v1324_v58 = vmul.f32 %v2438_v56, %v3979_v35 }
 0x6ea   :  { %v4006_v25 = vsel %vm1313_vm14, %v1314_v4, %v1312_v44  ;;  %v1319_v5 = vsel %vm1318_vm15, %v1294_v1, %v1317_v53  ;;  %vm1355_vm14 = vcmp.eq.f32.partialorder %v3995_v0, 0.0  ;;  %vm1360_vm15 = vcmp.eq.f32.partialorder %v3997_v16, inf }
 0x6eb   :  { %v1326_v17 = vsel %vm1325_vm2, %v3979_v35, %v1324_v58  ;;  %v1322_v15 = vsel %vm1320_vm1, %v1321_v31, %v1319_v5  ;;  %v1356_v35 = vand.u32 2147483648, %v3995_v0  ;;  %vm1362_vm1 = vcmp.eq.f32.partialorder %v3997_v16, 0.0 }
 0x6ec   :  { %v4036_v18 = vsel %vm1327_vm3, %v1328_v3, %v1326_v17  ;;  %vm1367_vm2 = vcmp.eq.f32.partialorder %v4000_v55, inf  ;;  %vm1369_vm3 = vcmp.eq.f32.partialorder %v4000_v55, 0.0 }
 0x708   :  { %v1763_v10 = vpop.xlane.xlu1 %1762 }
 0x709   :  { %v1760_v21 = vpop.xlane.xlu0 %1759  ;;  %v3981_v6 = vmax.f32 %v1763_v10, 1e-12 }
 0x70a   :  { %v3983_v26 = vmax.f32 %v1760_v21, 1e-12 }
 0x70b   :  { %2439 = vrsqrt.f32 %v3981_v6  ;;  %vm1831_vm7 = vcmp.eq.f32.partialorder %v3981_v6, inf  ;;  %v1834_v7 = vand.u32 2147483648, %v3981_v6  ;;  %vm1833_vm12 = vcmp.eq.f32.partialorder %v3981_v6, 0.0 }
 0x70c   :  { %2441 = vrsqrt.f32 %v3983_v26  ;;  %vm1824_vm9 = vcmp.eq.f32.partialorder %v3983_v26, inf  ;;  %v1827_v40 = vand.u32 2147483648, %v3983_v26  ;;  %vm1826_vm0 = vcmp.eq.f32.partialorder %v3983_v26, 0.0 }
 0x70d   :  { %2443 = vrsqrt.f32 %v3986_v54  ;;  %v654_v38 = vpop.xlane.xlu0 %653 }
 0x70e   :  { %2445 = vrsqrt.f32 %v3989_v12  ;;  %v4051_v49 = vmax.f32 %v654_v38, 1e-12 }
 0x70f   :  { %2447 = vrsqrt.f32 %v3993_v23 }
 0x710   :  { %v1769_v45 = vpop.xlane.xlu1 %1768  ;;  %2449 = vrsqrt.f32 %v3995_v0 }
 0x711   :  { %2451 = vrsqrt.f32 %v3997_v16  ;;  %v4010_v61 = vmax.f32 %v1769_v45, 1e-12  ;;  %v656_v27 = vpop.xlane.xlu0 %655 }
 0x712   :  { %2453 = vrsqrt.f32 %v4000_v55  ;;  %v4055_v2 = vmax.f32 %v656_v27, 1e-12 }
 0x713   :  { %2455 = vrsqrt.f32 %v4010_v61 }
 0x714   :  { %v1766_v60 = vpop.xlane.xlu1 %1765 }
 0x715   :  { %v2440_v29 = vpop.eup %2439  ;;  %v4014_v32 = vmax.f32 %v1766_v60, 1e-12  ;;  %v1363_v60 = vand.u32 2147483648, %v3997_v16 }
 0x716   :  { %v2442_v20 = vpop.eup %2441  ;;  %v1830_v42 = vmul.f32 %v2440_v29, %v3981_v6  ;;  %v1370_v29 = vand.u32 2147483648, %v4000_v55 }
 0x717   :  { %v2444_v24 = vpop.eup %2443  ;;  %v1823_v41 = vmul.f32 %v2442_v20, %v3983_v26  ;;  %2457 = vrsqrt.f32 %v4014_v32  ;;  %v1841_v27 = vand.u32 2147483648, %v4014_v32 }
 0x718   :  { %v2446_v9 = vpop.eup %2445  ;;  %v1331_v63 = vmul.f32 %v2444_v24, %v3986_v54  ;;  %v1832_v8 = vsel %vm1831_vm7, %v3981_v6, %v1830_v42  ;;  %v658_v6 = vpop.xlane.xlu0 %657  ;;  %2459 = vrsqrt.f32 %v4051_v49  ;;  %vm1845_vm7 = vcmp.eq.f32.partialorder %v4010_v61, inf }
 0x719   :  { %v2448_v47 = vpop.eup %2447  ;;  %v1825_v13 = vsel %vm1824_vm9, %v3983_v26, %v1823_v41  ;;  %v1338_v14 = vmul.f32 %v2446_v9, %v3989_v12  ;;  %v1835_v30 = vsel %vm1833_vm12, %v1834_v7, %v1832_v8  ;;  %2461 = vrsqrt.f32 %v4055_v2 }
 0x71a   :  { %v2450_v11 = vpop.eup %2449  ;;  %v1333_v62 = vsel %vm1332_vm4, %v3986_v54, %v1331_v63  ;;  %v1345_v34 = vmul.f32 %v2448_v47, %v3993_v23  ;;  %v1828_v28 = vsel %vm1826_vm0, %v1827_v40, %v1825_v13  ;;  %v1935_v21 = vsub.f32 %v1322_v15, %v1835_v30 }
 0x71b   :  { %v2452_v50 = vpop.eup %2451  ;;  %v1352_v59 = vmul.f32 %v2450_v11, %v3995_v0  ;;  %v4064_v10 = vsel %vm1334_vm5, %v1335_v39, %v1333_v62  ;;  %v1340_v26 = vsel %vm1339_vm6, %v3989_v12, %v1338_v14  ;;  %v1934_v46 = vsub.f32 %v4006_v25, %v1828_v28 }
 0x71c   :  { %v2454_v33 = vpop.eup %2453  ;;  %v1359_v37 = vmul.f32 %v2452_v50, %v3997_v16  ;;  %v1347_v54 = vsel %vm1346_vm8, %v3993_v23, %v1345_v34  ;;  %v4084_v4 = vmax.f32 %v658_v6, 1e-12  ;;  %v1951_v20 = vadd.f32 0.3, %v1935_v21  ;;  %v660_v41 = vpop.xlane.xlu0 %659 }
 0x71d   :  { %v1366_v36 = vmul.f32 %v2454_v33, %v4000_v55  ;;  %v1354_v45 = vsel %vm1353_vm11, %v3995_v0, %v1352_v59  ;;  %v2456_v52 = vpop.eup %2455  ;;  %v4094_v58 = vsel %vm1341_vm10, %v1342_v48, %v1340_v26  ;;  %v1950_v38 = vadd.f32 0.3, %v1934_v46 }
 0x71e   :  { %v1361_v56 = vsel %vm1360_vm15, %v3997_v16, %v1359_v37  ;;  %v4101_v31 = vsel %vm1348_vm13, %v1349_v22, %v1347_v54  ;;  %v4105_v5 = vsel %vm1355_vm14, %v1356_v35, %v1354_v45  ;;  %vm2046_vm4 = vcmask 7168  }
 0x71f   :  { %v1368_v44 = vsel %vm1367_vm2, %v4000_v55, %v1366_v36  ;;  %v4109_v42 = vsel %vm1362_vm1, %v1363_v60, %v1361_v56  ;;  %v1844_v55 = vmul.f32 %v2456_v52, %v4010_v61  ;;  %vm2063_vm5 = vcmask 15360  }
 0x720   :  { %v4111_v12 = vsel %vm1369_vm3, %v1370_v29, %v1368_v44  ;;  %v1967_v23 = vmax.f32 %v1951_v20, 0.0  ;;  %v1966_v0 = vmax.f32 %v1950_v38, 0.0  ;;  %vm1374_vm6 = vcmp.eq.f32.partialorder %v4051_v49, inf  ;;  %v662_v34 = vpop.xlane.xlu0 %661 }
 0x721   :  { %v2458_v53 = vpop.eup %2457  ;;  %v1377_v16 = vand.u32 2147483648, %v4051_v49  ;;  %vm1847_vm8 = vcmp.eq.f32.partialorder %v4010_v61, 0.0  ;;  %vm1838_vm9 = vcmp.eq.f32.partialorder %v4014_v32, inf  ;;  %v1846_v39 = vsel %vm1845_vm7, %v4010_v61, %v1844_v55 }
 0x722   :  { %v1837_v3 = vmul.f32 %v2458_v53, %v4014_v32  ;;  %v2460_v63 = vpop.eup %2459  ;;  %v1848_v47 = vand.u32 2147483648, %v4010_v61  ;;  %v1983_v8 = vmul.f32 0.015625, %v1967_v23  ;;  %vm1999_vm10 = vcmp.gt.f32.partialorder %v1951_v20, 0.0 }
 0x723   :  { %v2462_v11 = vpop.eup %2461  ;;  %vm1381_vm11 = vcmp.eq.f32.partialorder %v4055_v2, inf  ;;  %v1982_v50 = vmul.f32 0.015625, %v1966_v0  ;;  %vm1998_vm12 = vcmp.gt.f32.partialorder %v1950_v38, 0.0  ;;  %vm1840_vm13 = vcmp.eq.f32.partialorder %v4014_v32, 0.0 }
 0x724   :  { %v1839_v15 = vsel %vm1838_vm9, %v4014_v32, %v1837_v3  ;;  %v4133_v22 = vmax.f32 %v660_v41, 1e-12  ;;  %v1373_v7 = vmul.f32 %v2460_v63, %v4051_v49  ;;  %vm1376_vm0 = vcmp.eq.f32.partialorder %v4051_v49, 0.0 }
 0x725   :  { %v1849_v13 = vsel %vm1847_vm8, %v1848_v47, %v1846_v39  ;;  %vm1383_vm14 = vcmp.eq.f32.partialorder %v4055_v2, 0.0  ;;  %v1842_v33 = vsel %vm1840_vm13, %v1841_v27, %v1839_v15  ;;  %v2515_v40 = vmov 0.0   ;;  %v664_v39 = vpop.xlane.xlu0 %663 }
 0x726   :  { %v2157_v14 = vsel %vm1999_vm10, 1.0, %v2515_v40  ;;  %v1380_v32 = vmul.f32 %v2462_v11, %v4055_v2  ;;  %v1384_v30 = vand.u32 2147483648, %v4055_v2  ;;  %v2156_v59 = vsel %vm1998_vm12, 1.0, %v2515_v40 }
 0x727   :  { %v2048_v61 = vsel %vm2046_vm4, %v1983_v8, %v2157_v14  ;;  %v2047_v36 = vsel %vm2046_vm4, %v1982_v50, %v2156_v59  ;;  %v1937_v35 = vsub.f32 %v4064_v10, %v1849_v13  ;;  %v1936_v21 = vsub.f32 %v4036_v18, %v1842_v33 }
 0x728   :  { %v1375_v26 = vsel %vm1374_vm6, %v4051_v49, %v1373_v7  ;;  %vm1388_vm15 = vcmp.eq.f32.partialorder %v4084_v4, inf  ;;  %v1391_v46 = vand.u32 2147483648, %v4084_v4  ;;  %v4161_v54 = vmax.f32 %v662_v34, 1e-12 }
 0x729   :  { %v2065_v52 = vsel %vm2063_vm5, %v2048_v61, 0.0  ;;  %v1382_v18 = vsel %vm1381_vm11, %v4055_v2, %v1380_v32  ;;  %vm1390_vm1 = vcmp.eq.f32.partialorder %v4084_v4, 0.0  ;;  %v2064_v56 = vsel %vm2063_vm5, %v2047_v36, 0.0 }
 0x72a   :  { %v1953_v60 = vadd.f32 0.3, %v1937_v35  ;;  %v1952_v29 = vadd.f32 0.3, %v1936_v21  ;;  %v4186_v3 = vsel %vm1376_vm0, %v1377_v16, %v1375_v26  ;;  %v4190_v23 = vsel %vm1383_vm14, %v1384_v30, %v1382_v18 }
 0x72b   :  { %v1398_v0 = vand.u32 2147483648, %v4133_v22  ;;  %v4220_v30 = vmax.f32 %v664_v39, 1e-12 }
 0x72c   :  { %vm2001_vm7 = vcmp.gt.f32.partialorder %v1953_v60, 0.0  ;;  %v1968_v16 = vmax.f32 %v1952_v29, 0.0  ;;  %v1969_v27 = vmax.f32 %v1953_v60, 0.0  ;;  %vm2000_vm11 = vcmp.gt.f32.partialorder %v1952_v29, 0.0 }
 0x72d   :  { %v2159_v33 = vsel %vm2001_vm7, 1.0, %v2515_v40  ;;  %vm1395_vm7 = vcmp.eq.f32.partialorder %v4133_v22, inf }
 0x72e   :  { %v1985_v34 = vmul.f32 0.015625, %v1969_v27 }
 0x72f   :  { %v4016_v19 = vpop.xlane.xlu1 %1774 }
 0x730   :  { %v4090_v25 = vmax.f32 %v4016_v19, 1e-12 }
 0x732   :  { %vm1859_vm6 = vcmp.eq.f32.partialorder %v4090_v25, inf  ;;  %v1862_v47 = vand.u32 2147483648, %v4090_v25  ;;  %vm1861_vm9 = vcmp.eq.f32.partialorder %v4090_v25, 0.0 }
 0x733   :  { %v1772_v57 = vpop.xlane.xlu1 %1771 }
 0x734   :  { %v4060_v1 = vmax.f32 %v1772_v57, 1e-12 }
 0x736   :  { %2463 = vrsqrt.f32 %v4060_v1  ;;  %vm1852_vm2 = vcmp.eq.f32.partialorder %v4060_v1, inf  ;;  %v1855_v38 = vand.u32 2147483648, %v4060_v1  ;;  %vm1854_vm3 = vcmp.eq.f32.partialorder %v4060_v1, 0.0 }
 0x737   :  { %v1781_v43 = vpop.xlane.xlu1 %1780  ;;  %2465 = vrsqrt.f32 %v4084_v4 }
 0x738   :  { %2467 = vrsqrt.f32 %v4090_v25  ;;  %v4123_v9 = vmax.f32 %v1781_v43, 1e-12 }
 0x73a   :  { %vm1873_vm12 = vcmp.eq.f32.partialorder %v4123_v9, inf  ;;  %v1876_v36 = vand.u32 2147483648, %v4123_v9  ;;  %vm1875_vm0 = vcmp.eq.f32.partialorder %v4123_v9, 0.0 }
 0x73b   :  { %v1778_v51 = vpop.xlane.xlu1 %1777 }
 0x73c   :  { %v4097_v24 = vmax.f32 %v1778_v51, 1e-12 }
 0x73e   :  { %2469 = vrsqrt.f32 %v4097_v24  ;;  %vm1866_vm8 = vcmp.eq.f32.partialorder %v4097_v24, inf  ;;  %v1869_v50 = vand.u32 2147483648, %v4097_v24  ;;  %vm1868_vm10 = vcmp.eq.f32.partialorder %v4097_v24, 0.0 }
 0x73f   :  { %v1787_v19 = vpop.xlane.xlu1 %1786  ;;  %2471 = vrsqrt.f32 %v4123_v9 }
 0x740   :  { %v2464_v57 = vpop.eup %2463  ;;  %v4150_v43 = vmax.f32 %v1787_v19, 1e-12 }
 0x741   :  { %v1851_v28 = vmul.f32 %v2464_v57, %v4060_v1  ;;  %v2466_v37 = vpop.eup %2465 }
 0x742   :  { %v2468_v6 = vpop.eup %2467  ;;  %v1387_v44 = vmul.f32 %v2466_v37, %v4084_v4  ;;  %v666_v37 = vpop.xlane.xlu0 %665 }
 0x743   :  { %v1784_v17 = vpop.xlane.xlu1 %1783  ;;  %v1853_v53 = vsel %vm1852_vm2, %v4060_v1, %v1851_v28  ;;  %v1858_v20 = vmul.f32 %v2468_v6, %v4090_v25  ;;  %v2158_v28 = vsel %vm2000_vm11, 1.0, %v2515_v40 }
 0x744   :  { %v4128_v48 = vmax.f32 %v1784_v17, 1e-12  ;;  %v1856_v41 = vsel %vm1854_vm3, %v1855_v38, %v1853_v53  ;;  %v4193_v17 = vadd.f32 %v2065_v52, %v2064_v56  ;;  %v1389_v63 = vsel %vm1388_vm15, %v4084_v4, %v1387_v44 }
 0x745   :  { %v1860_v2 = vsel %vm1859_vm6, %v4090_v25, %v1858_v20  ;;  %v1938_v15 = vsub.f32 %v4094_v58, %v1856_v41  ;;  %v4211_v7 = vsel %vm1390_vm1, %v1391_v46, %v1389_v63  ;;  %vm1887_vm15 = vcmp.eq.f32.partialorder %v4150_v43, inf }
 0x746   :  { %2473 = vrsqrt.f32 %v4128_v48  ;;  %v1863_v13 = vsel %vm1861_vm9, %v1862_v47, %v1860_v2  ;;  %vm1880_vm13 = vcmp.eq.f32.partialorder %v4128_v48, inf  ;;  %v1883_v26 = vand.u32 2147483648, %v4128_v48 }
 0x747   :  { %v1793_v62 = vpop.xlane.xlu1 %1792  ;;  %2475 = vrsqrt.f32 %v4133_v22  ;;  %v1954_v4 = vadd.f32 0.3, %v1938_v15  ;;  %vm1882_vm14 = vcmp.eq.f32.partialorder %v4128_v48, 0.0  ;;  %v1890_v20 = vand.u32 2147483648, %v4150_v43 }
 0x748   :  { %v2470_v51 = vpop.eup %2469  ;;  %2477 = vrsqrt.f32 %v4150_v43  ;;  %v4179_v55 = vmax.f32 %v1793_v62, 1e-12  ;;  %v1984_v62 = vmul.f32 0.015625, %v1968_v16  ;;  %vm1889_vm3 = vcmp.eq.f32.partialorder %v4150_v43, 0.0 }
 0x749   :  { %v1865_v19 = vmul.f32 %v2470_v51, %v4097_v24  ;;  %v2472_v1 = vpop.eup %2471  ;;  %vm2002_vm2 = vcmp.gt.f32.partialorder %v1954_v4, 0.0 }
 0x74a   :  { %v1872_v57 = vmul.f32 %v2472_v1, %v4123_v9  ;;  %v2049_v6 = vsel %vm2046_vm4, %v1984_v62, %v2158_v28 }
 0x74b   :  { %v1790_v45 = vpop.xlane.xlu1 %1789  ;;  %v1867_v11 = vsel %vm1866_vm8, %v4097_v24, %v1865_v19  ;;  %v1939_v24 = vsub.f32 %v4101_v31, %v1863_v13  ;;  %v2067_v53 = vsel %vm2063_vm5, %v2049_v6, 0.0  ;;  %vm1402_vm8 = vcmp.eq.f32.partialorder %v4161_v54, inf }
 0x74c   :  { %v4169_v10 = vmax.f32 %v1790_v45, 1e-12  ;;  %v1870_v14 = vsel %vm1868_vm10, %v1869_v50, %v1867_v11  ;;  %v1874_v61 = vsel %vm1873_vm12, %v4123_v9, %v1872_v57  ;;  %v1970_v45 = vmax.f32 %v1954_v4, 0.0 }
 0x74d   :  { %v1940_v35 = vsub.f32 %v4105_v5, %v1870_v14  ;;  %v1877_v51 = vsel %vm1875_vm0, %v1876_v36, %v1874_v61  ;;  %v4237_v5 = vmax.f32 %v666_v37, 1e-12  ;;  %v1955_v18 = vadd.f32 0.3, %v1939_v24 }
 0x74e   :  { %2479 = vrsqrt.f32 %v4169_v10  ;;  %v2050_v9 = vsel %vm2046_vm4, %v1985_v34, %v2159_v33  ;;  %v1941_v29 = vsub.f32 %v4109_v42, %v1877_v51  ;;  %vm1894_vm1 = vcmp.eq.f32.partialorder %v4169_v10, inf }
 0x74f   :  { %2481 = vrsqrt.f32 %v4161_v54  ;;  %v1956_v60 = vadd.f32 0.3, %v1940_v35  ;;  %v1986_v38 = vmul.f32 0.015625, %v1970_v45  ;;  %v1971_v1 = vmax.f32 %v1955_v18, 0.0 }
 0x750   :  { %v2474_v49 = vpop.eup %2473  ;;  %2483 = vrsqrt.f32 %v4179_v55  ;;  %v2069_v42 = vsel %vm2063_vm5, %v2050_v9, 0.0  ;;  %vm1896_vm6 = vcmp.eq.f32.partialorder %v4169_v10, 0.0  ;;  %v2068_v39 = vadd.f32 %v2067_v53, %v4193_v17 }
 0x751   :  { %v2476_v8 = vpop.eup %2475  ;;  %v1879_v58 = vmul.f32 %v2474_v49, %v4128_v48  ;;  %2485 = vrsqrt.f32 %v4220_v30  ;;  %v1897_v49 = vand.u32 2147483648, %v4169_v10  ;;  %v1972_v16 = vmax.f32 %v1956_v60, 0.0 }
 0x752   :  { %v2478_v25 = vpop.eup %2477  ;;  %v4218_v32 = vmul.f32 %v2476_v8, %v4133_v22  ;;  %v1957_v47 = vadd.f32 0.3, %v1941_v29  ;;  %vm2003_vm9 = vcmp.gt.f32.partialorder %v1955_v18, 0.0  ;;  %vm1901_vm10 = vcmp.eq.f32.partialorder %v4179_v55, inf }
 0x753   :  { %v1881_v21 = vsel %vm1880_vm13, %v4128_v48, %v1879_v58  ;;  %v1886_v31 = vmul.f32 %v2478_v25, %v4150_v43  ;;  %v1987_v8 = vmul.f32 0.015625, %v1971_v1  ;;  %v1904_v17 = vand.u32 2147483648, %v4179_v55 }
 0x754   :  { %v1884_v56 = vsel %vm1882_vm14, %v1883_v26, %v1881_v21  ;;  %v1988_v50 = vmul.f32 0.015625, %v1972_v16  ;;  %vm2004_vm11 = vcmp.gt.f32.partialorder %v1956_v60, 0.0  ;;  %v2070_v62 = vadd.f32 %v2069_v42, %v2068_v39 }
 0x755   :  { %v1888_v48 = vsel %vm1887_vm15, %v4150_v43, %v1886_v31  ;;  %v1942_v19 = vsub.f32 %v4111_v12, %v1884_v56  ;;  %v2160_v12 = vsel %vm2002_vm2, 1.0, %v2515_v40  ;;  %v1973_v25 = vmax.f32 %v1957_v47, 0.0 }
 0x756   :  { %v1891_v2 = vsel %vm1889_vm3, %v1890_v20, %v1888_v48  ;;  %v2051_v43 = vsel %vm2046_vm4, %v1986_v38, %v2160_v12  ;;  %vm1903_vm12 = vcmp.eq.f32.partialorder %v4179_v55, 0.0  ;;  %vm1397_vm13 = vcmp.eq.f32.partialorder %v4133_v22, 0.0 }
 0x757   :  { %v1958_v11 = vadd.f32 0.3, %v1942_v19  ;;  %v1943_v27 = vsub.f32 %v4186_v3, %v1891_v2  ;;  %v2071_v14 = vsel %vm2063_vm5, %v2051_v43, 0.0  ;;  %vm1404_vm0 = vcmp.eq.f32.partialorder %v4161_v54, 0.0 }
 0x758   :  { %v2480_v59 = vpop.eup %2479  ;;  %v2161_v3 = vsel %vm2003_vm9, 1.0, %v2515_v40  ;;  %v2162_v61 = vsel %vm2004_vm11, 1.0, %v2515_v40  ;;  %v2072_v28 = vadd.f32 %v2071_v14, %v2070_v62  ;;  %v1989_v21 = vmul.f32 0.015625, %v1973_v25 }
 0x759   :  { %v2482_v46 = vpop.eup %2481  ;;  %v1893_v52 = vmul.f32 %v2480_v59, %v4169_v10  ;;  %v1974_v4 = vmax.f32 %v1958_v11, 0.0  ;;  %v2052_v24 = vsel %vm2046_vm4, %v1987_v8, %v2161_v3  ;;  %v1959_v59 = vadd.f32 0.3, %v1943_v27 }
 0x75a   :  { %v2484_v44 = vpop.eup %2483  ;;  %v2053_v37 = vsel %vm2046_vm4, %v1988_v50, %v2162_v61  ;;  %vm2005_vm14 = vcmp.gt.f32.partialorder %v1957_v47, 0.0  ;;  %v1396_v31 = vsel %vm1395_vm7, %v4133_v22, %v4218_v32  ;;  %vm2006_vm15 = vcmp.gt.f32.partialorder %v1958_v11, 0.0 }
 0x75b   :  { %v1895_v41 = vsel %vm1894_vm1, %v4169_v10, %v1893_v52  ;;  %v1900_v63 = vmul.f32 %v2484_v44, %v4179_v55  ;;  %v4265_v33 = vpop.eup %2485  ;;  %v1990_v26 = vmul.f32 0.015625, %v1974_v4  ;;  %v2073_v45 = vsel %vm2063_vm5, %v2052_v24, 0.0 }
 0x75c   :  { %v1898_v15 = vsel %vm1896_vm6, %v1897_v49, %v1895_v41  ;;  %v2075_v51 = vsel %vm2063_vm5, %v2053_v37, 0.0  ;;  %v1975_v52 = vmax.f32 %v1959_v59, 0.0  ;;  %v2074_v56 = vadd.f32 %v2073_v45, %v2072_v28 }
 0x75d   :  { %v1902_v10 = vsel %vm1901_vm10, %v4179_v55, %v1900_v63  ;;  %v1944_v13 = vsub.f32 %v4190_v23, %v1898_v15  ;;  %v1401_v23 = vmul.f32 %v2482_v46, %v4161_v54  ;;  %v1405_v32 = vand.u32 2147483648, %v4161_v54 }
 0x75e   :  { %v1905_v34 = vsel %vm1903_vm12, %v1904_v17, %v1902_v10  ;;  %v2164_v60 = vsel %vm2006_vm15, 1.0, %v2515_v40  ;;  %v2076_v48 = vadd.f32 %v2075_v51, %v2074_v56  ;;  %vm2007_vm1 = vcmp.gt.f32.partialorder %v1959_v59, 0.0 }
 0x75f   :  { %v1960_v36 = vadd.f32 0.3, %v1944_v13  ;;  %v1945_v6 = vsub.f32 %v4211_v7, %v1905_v34  ;;  %v1403_v46 = vsel %vm1402_vm8, %v4161_v54, %v1401_v23  ;;  %v2163_v7 = vsel %vm2005_vm14, 1.0, %v2515_v40 }
 0x760   :  { %v2054_v53 = vsel %vm2046_vm4, %v1989_v21, %v2163_v7  ;;  %v2055_v20 = vsel %vm2046_vm4, %v1990_v26, %v2164_v60  ;;  %v1399_v38 = vsel %vm1397_vm13, %v1398_v0, %v1396_v31  ;;  %v1406_v19 = vsel %vm1404_vm0, %v1405_v32, %v1403_v46 }
 0x761   :  { %v1976_v44 = vmax.f32 %v1960_v36, 0.0  ;;  %v1961_v29 = vadd.f32 0.3, %v1945_v6  ;;  %v1412_v41 = vand.u32 2147483648, %v4220_v30  ;;  %v1991_v1 = vmul.f32 0.015625, %v1975_v52 }
 0x762   :  { %vm1409_vm2 = vcmp.eq.f32.partialorder %v4220_v30, inf  ;;  %v2077_v42 = vsel %vm2063_vm5, %v2054_v53, 0.0  ;;  %vm2008_vm3 = vcmp.gt.f32.partialorder %v1960_v36, 0.0  ;;  %v2165_v39 = vsel %vm2007_vm1, 1.0, %v2515_v40 }
 0x763   :  { %v1992_v16 = vmul.f32 0.015625, %v1976_v44  ;;  %v2079_v22 = vsel %vm2063_vm5, %v2055_v20, 0.0  ;;  %v1977_v0 = vmax.f32 %v1961_v29, 0.0  ;;  %vm1416_vm6 = vcmp.eq.f32.partialorder %v4237_v5, inf }
 0x764   :  { %v1799_v57 = vpop.xlane.xlu1 %1798  ;;  %v2078_v12 = vadd.f32 %v2077_v42, %v2076_v48  ;;  %vm1411_vm8 = vcmp.eq.f32.partialorder %v4220_v30, 0.0  ;;  %v2056_v43 = vsel %vm2046_vm4, %v1991_v1, %v2165_v39  ;;  %v2166_v11 = vsel %vm2008_vm3, 1.0, %v2515_v40 }
 0x765   :  { %v4263_v58 = vmax.f32 %v1799_v57, 1e-12  ;;  %v1408_v10 = vmul.f32 %v4265_v33, %v4220_v30  ;;  %v2057_v57 = vsel %vm2046_vm4, %v1992_v16, %v2166_v11  ;;  %v1993_v13 = vmul.f32 0.015625, %v1977_v0 }
 0x766   :  { %v2080_v17 = vadd.f32 %v2079_v22, %v2078_v12  ;;  %vm2009_vm10 = vcmp.gt.f32.partialorder %v1961_v29, 0.0  ;;  %v2081_v3 = vsel %vm2063_vm5, %v2056_v43, 0.0  ;;  %v2083_v4 = vsel %vm2063_vm5, %v2057_v57, 0.0 }
 0x767   :  { %2487 = vrsqrt.f32 %v4263_v58  ;;  %vm1915_vm7 = vcmp.eq.f32.partialorder %v4263_v58, inf  ;;  %v1918_v47 = vand.u32 2147483648, %v4263_v58  ;;  %vm1917_vm9 = vcmp.eq.f32.partialorder %v4263_v58, 0.0 }
 0x768   :  { %v1796_v55 = vpop.xlane.xlu1 %1795  ;;  %2489 = vrsqrt.f32 %v4237_v5  ;;  %vm1418_vm13 = vcmp.eq.f32.partialorder %v4237_v5, 0.0  ;;  %v2167_v24 = vsel %vm2009_vm10, 1.0, %v2515_v40  ;;  %v2082_v61 = vadd.f32 %v2081_v3, %v2080_v17 }
 0x769   :  { %v4279_v35 = vmax.f32 %v1796_v55, 1e-12  ;;  %v1410_v55 = vsel %vm1409_vm2, %v4220_v30, %v1408_v10  ;;  %v2058_v28 = vsel %vm2046_vm4, %v1993_v13, %v2167_v24  ;;  %v1419_v52 = vand.u32 2147483648, %v4237_v5 }
 0x76a   :  { %v2084_v21 = vadd.f32 %v2083_v4, %v2082_v61  ;;  %v1413_v51 = vsel %vm1411_vm8, %v1412_v41, %v1410_v55 }
 0x76b   :  { %2491 = vrsqrt.f32 %v4279_v35  ;;  %vm1908_vm11 = vcmp.eq.f32.partialorder %v4279_v35, inf  ;;  %vm1910_vm12 = vcmp.eq.f32.partialorder %v4279_v35, 0.0 }
 0x76c   :  { %v1802_v18 = vpop.xlane.xlu1 %1801 }
 0x76d   :  { %v4294_v9 = vmax.f32 %v1802_v18, 1e-12  ;;  %v2085_v18 = vsel %vm2063_vm5, %v2058_v28, 0.0 }
 0x76e   :  { %v2086_v60 = vadd.f32 %v2085_v18, %v2084_v21 }
 0x76f   :  { %2493 = vrsqrt.f32 %v4294_v9  ;;  %vm1922_vm0 = vcmp.eq.f32.partialorder %v4294_v9, inf  ;;  %vm1924_vm14 = vcmp.eq.f32.partialorder %v4294_v9, 0.0 }
 0x770   :  { %v1805_v63 = vpop.xlane.xlu1 %1804 }
 0x771   :  { %v2488_v49 = vpop.eup %2487  ;;  %v4310_v2 = vmax.f32 %v1805_v63, 1e-12 }
 0x772   :  { %v1914_v54 = vmul.f32 %v2488_v49, %v4263_v58  ;;  %v2490_v15 = vpop.eup %2489 }
 0x773   :  { %2495 = vrsqrt.f32 %v4310_v2  ;;  %v1415_v25 = vmul.f32 %v2490_v15, %v4237_v5  ;;  %vm1929_vm2 = vcmp.eq.f32.partialorder %v4310_v2, inf  ;;  %v1932_v30 = vand.u32 2147483648, %v4310_v2 }
 0x774   :  { %v1916_v8 = vsel %vm1915_vm7, %v4263_v58, %v1914_v54  ;;  %v1911_v58 = vand.u32 2147483648, %v4279_v35  ;;  %vm1931_vm3 = vcmp.eq.f32.partialorder %v4310_v2, 0.0 }
 0x775   :  { %v2492_v27 = vpop.eup %2491  ;;  %v1919_v50 = vsel %vm1917_vm9, %v1918_v47, %v1916_v8  ;;  %v1417_v31 = vsel %vm1416_vm6, %v4237_v5, %v1415_v25 }
 0x776   :  { %v1947_v62 = vsub.f32 %v1406_v19, %v1919_v50  ;;  %v1907_v14 = vmul.f32 %v2492_v27, %v4279_v35  ;;  %v1420_v32 = vsel %vm1418_vm13, %v1419_v52, %v1417_v31 }
 0x778   :  { %v1963_v33 = vadd.f32 0.3, %v1947_v62  ;;  %v1909_v34 = vsel %vm1908_vm11, %v4279_v35, %v1907_v14  ;;  %v1925_v35 = vand.u32 2147483648, %v4294_v9 }
 0x779   :  { %v2494_v23 = vpop.eup %2493  ;;  %v1912_v59 = vsel %vm1910_vm12, %v1911_v58, %v1909_v34 }
 0x77a   :  { %v1946_v37 = vsub.f32 %v1399_v38, %v1912_v59  ;;  %v1921_v36 = vmul.f32 %v2494_v23, %v4294_v9  ;;  %v1979_v6 = vmax.f32 %v1963_v33, 0.0  ;;  %vm2011_vm15 = vcmp.gt.f32.partialorder %v1963_v33, 0.0 }
 0x77b   :  { %v2169_v20 = vsel %vm2011_vm15, 1.0, %v2515_v40 }
 0x77c   :  { %v1962_v26 = vadd.f32 0.3, %v1946_v37  ;;  %v1923_v46 = vsel %vm1922_vm0, %v4294_v9, %v1921_v36  ;;  %v1995_v53 = vmul.f32 0.015625, %v1979_v6 }
 0x77d   :  { %v2496_v45 = vpop.eup %2495  ;;  %v1926_v7 = vsel %vm1924_vm14, %v1925_v35, %v1923_v46 }
 0x77e   :  { %v1978_v56 = vmax.f32 %v1962_v26, 0.0  ;;  %vm2010_vm1 = vcmp.gt.f32.partialorder %v1962_v26, 0.0  ;;  %v1948_v44 = vsub.f32 %v1413_v51, %v1926_v7  ;;  %v1928_v9 = vmul.f32 %v2496_v45, %v4310_v2 }
 0x77f   :  { %v2168_v38 = vsel %vm2010_vm1, 1.0, %v2515_v40  ;;  %v2060_v63 = vsel %vm2046_vm4, %v1995_v53, %v2169_v20 }
 0x780   :  { %v1994_v29 = vmul.f32 0.015625, %v1978_v56  ;;  %v1964_v48 = vadd.f32 0.3, %v1948_v44  ;;  %v1930_v19 = vsel %vm1929_vm2, %v4310_v2, %v1928_v9  ;;  %v2089_v54 = vsel %vm2063_vm5, %v2060_v63, 0.0 }
 0x781   :  { %v1933_v1 = vsel %vm1931_vm3, %v1932_v30, %v1930_v19 }
 0x782   :  { %v2059_v5 = vsel %vm2046_vm4, %v1994_v29, %v2168_v38  ;;  %v1980_v41 = vmax.f32 %v1964_v48, 0.0  ;;  %vm2012_vm6 = vcmp.gt.f32.partialorder %v1964_v48, 0.0  ;;  %v1949_v42 = vsub.f32 %v1420_v32, %v1933_v1 }
 0x783   :  { %v2087_v49 = vsel %vm2063_vm5, %v2059_v5, 0.0  ;;  %v2170_v22 = vsel %vm2012_vm6, 1.0, %v2515_v40 }
 0x784   :  { %v2088_v16 = vadd.f32 %v2087_v49, %v2086_v60  ;;  %v1996_v39 = vmul.f32 0.015625, %v1980_v41  ;;  %v1965_v0 = vadd.f32 0.3, %v1949_v42 }
 0x786   :  { %v2061_v12 = vsel %vm2046_vm4, %v1996_v39, %v2170_v22  ;;  %v2090_v2 = vadd.f32 %v2089_v54, %v2088_v16  ;;  %v1981_v47 = vmax.f32 %v1965_v0, 0.0  ;;  %vm2013_vm7 = vcmp.gt.f32.partialorder %v1965_v0, 0.0 }
 0x787   :  { %v2091_v15 = vsel %vm2063_vm5, %v2061_v12, 0.0  ;;  %v2171_v11 = vsel %vm2013_vm7, 1.0, %v2515_v40 }
 0x788   :  { %v1997_v43 = vmul.f32 0.015625, %v1981_v47  ;;  %v2092_v8 = vadd.f32 %v2091_v15, %v2090_v2 }
 0x78a   :  { %v2062_v27 = vsel %vm2046_vm4, %v1997_v43, %v2171_v11 }
 0x78b   :  { %v2093_v10 = vsel %vm2063_vm5, %v2062_v27, 0.0 }
 0x78c   :  { %v2094_v17 = vadd.f32 %v2093_v10, %v2092_v8 }
 0x78e   :  { %v2095_v57 = vrot.slane %v2094_v17, 4 }
 0x790   :  { %v2096_v50 = vadd.f32 %v2095_v57, %v2094_v17 }
 0x792   :  { %v2097_v13 = vrot.slane %v2096_v50, 2 }
 0x794   :  { %v2098_v62 = vadd.f32 %v2097_v13, %v2096_v50 }
 0x796   :  { %v2099_v14 = vrot.slane %v2098_v62, 1 }
 0x798   :  { %v2100_v25 = vadd.f32 %v2099_v14, %v2098_v62 }
 0x79a   :  { %v2101_v3 = vsel %vm2063_vm5, %v2100_v25, 0.0 }
 0x79b   :  { %2102 = vst [vmem:[%s4380_s4] sm:$0x1] %v2101_v3 }

</bundles_post_ra>
